<compile_context>
chip_gen: v7x
topology: tpu7x:2x2x1
jax: 0.10.0
libtpu: 0.0.40
codegen_flags: <defaults>
</compile_context>

<pallas_src>
import functools

import jax
import jax.numpy as jnp
from jax import lax
from jax.experimental import pallas as pl
from jax.experimental.pallas import tpu as pltpu


# ----------------------------------------------------------------------------
# Fused MultiHeadAttention kernel
# ----------------------------------------------------------------------------
def _mha_kernel(q_ref, k_ref, v_ref, bias_ref,
                wq_ref, wk_ref, wv_ref, wfc_ref,
                gamma_ref, beta_ref,
                out_ref,
                *, n_head, d_k, d_v, eps):
    # Weights / affine params loaded once per grid step.
    wq = wq_ref[...]                       # (d_model, n_head*d_k)
    wk = wk_ref[...]                       # (d_model, n_head*d_k)
    wv = wv_ref[...]                       # (d_model, n_head*d_v)
    wfc = wfc_ref[...]                     # (n_head*d_v, d_model)
    gamma = gamma_ref[...].astype(jnp.float32)   # (1, d_model)
    beta = beta_ref[...].astype(jnp.float32)     # (1, d_model)

    inv_temp = jnp.float32(1.0 / (d_k ** 0.5))
    bt = q_ref.shape[0]                    # batch elements in this block

    for b in range(bt):                    # static, unrolled
        q = q_ref[b]                       # (Lq, d_model)
        k = k_ref[b]                       # (Lk, d_model)
        v = v_ref[b]                       # (Lk, d_model)
        bias = bias_ref[b].astype(jnp.float32)   # (Lq, Lk) additive mask bias

        residual = q.astype(jnp.float32)

        # Full-width fused projections (one wide MXU matmul each).
        qw = jnp.dot(q, wq, preferred_element_type=jnp.float32) * inv_temp
        kw = jnp.dot(k, wk, preferred_element_type=jnp.float32)
        vw = jnp.dot(v, wv, preferred_element_type=jnp.float32)

        o = residual                       # accumulate heads + residual
        for h in range(n_head):            # static, unrolled
            qh = qw[:, h * d_k:(h + 1) * d_k]        # (Lq, d_k)
            kh = kw[:, h * d_k:(h + 1) * d_k]        # (Lk, d_k)
            vh = vw[:, h * d_v:(h + 1) * d_v]        # (Lk, d_v)

            # Scores without materializing kh.T: contract shared last dim.
            s = lax.dot_general(qh, kh, (((1,), (1,)), ((), ())),
                                preferred_element_type=jnp.float32)  # (Lq, Lk)
            s = s + bias

            # Numerically-stable softmax; divide moved to EUP reciprocal.
            m = jnp.max(s, axis=-1, keepdims=True)
            p = jnp.exp(s - m)
            denom = jnp.sum(p, axis=-1, keepdims=True)
            p = p * pl.reciprocal(denom, approx=True)

            # Fold this head straight into d_model width via a sublane-aligned
            # row slice of the output projection (no lane concat).
            pv = jnp.dot(vh, wfc[h * d_v:(h + 1) * d_v, :],
                         preferred_element_type=jnp.float32)          # (Lk, d_model)
            o = o + jnp.dot(p, pv, preferred_element_type=jnp.float32)

        # LayerNorm (eps=1e-6, elementwise affine).
        mean = jnp.mean(o, axis=-1, keepdims=True)
        var = jnp.mean((o - mean) ** 2, axis=-1, keepdims=True)
        o = (o - mean) * lax.rsqrt(var + jnp.float32(eps))
        o = o * gamma + beta

        out_ref[b] = o.astype(out_ref.dtype)


def _batch_block(B):
    # Two grid steps (one per v7x TensorCore) with the fattest even split;
    # fall back to one element per step for odd/small B.
    return B // 2 if (B >= 2 and B % 2 == 0) else 1


def multi_head_attention(q, k, v, bias, params, *, n_head, d_k, d_v):
    """q: (B,Lq,D), k,v: (B,Lk,D), bias: (B,Lq,Lk) f32 additive mask bias."""
    B, Lq, d_model = q.shape
    Lk = k.shape[1]
    Bt = _batch_block(B)
    grid = (B // Bt,)

    gamma = params["ln_gamma"].reshape(1, d_model)
    beta = params["ln_beta"].reshape(1, d_model)

    kernel = functools.partial(_mha_kernel, n_head=n_head, d_k=d_k, d_v=d_v,
                               eps=1e-6)

    def rep(shape):  # replicated (grid-invariant) spec, e.g. weights
        return pl.BlockSpec(shape, lambda b: (0,) * len(shape))

    return pl.pallas_call(
        kernel,
        out_shape=jax.ShapeDtypeStruct((B, Lq, d_model), q.dtype),
        grid_spec=pltpu.PrefetchScalarGridSpec(
            num_scalar_prefetch=0,
            grid=grid,
            in_specs=[
                pl.BlockSpec((Bt, Lq, d_model), lambda b: (b, 0, 0)),   # q
                pl.BlockSpec((Bt, Lk, d_model), lambda b: (b, 0, 0)),   # k
                pl.BlockSpec((Bt, Lk, d_model), lambda b: (b, 0, 0)),   # v
                pl.BlockSpec((Bt, Lq, Lk), lambda b: (b, 0, 0)),        # bias
                rep(params["w_qs"].shape),
                rep(params["w_ks"].shape),
                rep(params["w_vs"].shape),
                rep(params["fc"].shape),
                rep(gamma.shape),
                rep(beta.shape),
            ],
            out_specs=pl.BlockSpec((Bt, Lq, d_model), lambda b: (b, 0, 0)),
        ),
        compiler_params=pltpu.CompilerParams(
            dimension_semantics=("parallel",),
            vmem_limit_bytes=32 * 1024 * 1024),
    )(q, k, v, bias,
      params["w_qs"], params["w_ks"], params["w_vs"], params["fc"],
      gamma, beta)


# ----------------------------------------------------------------------------
# Small elementwise kernel: out = a + b, optionally ReLU'ed
# ----------------------------------------------------------------------------
def _add_act_kernel(a_ref, b_ref, o_ref, *, apply_relu):
    x = a_ref[...].astype(jnp.float32) + b_ref[...].astype(jnp.float32)
    if apply_relu:
        x = jnp.maximum(x, jnp.float32(0.0))
    o_ref[...] = x.astype(o_ref.dtype)


def add_act(a, b, *, relu):
    kernel = functools.partial(_add_act_kernel, apply_relu=relu)
    return pl.pallas_call(
        kernel, out_shape=jax.ShapeDtypeStruct(a.shape, a.dtype))(a, b)


# ----------------------------------------------------------------------------
# Final head: Linear -> LeakyReLU(alpha) -> Linear
# ----------------------------------------------------------------------------
def _mlp_kernel(x_ref, w1_ref, b1_ref, w2_ref, b2_ref, o_ref, *, alpha):
    w1 = w1_ref[...]
    b1 = b1_ref[...].astype(jnp.float32)   # (1, D)
    w2 = w2_ref[...]
    b2 = b2_ref[...].astype(jnp.float32)   # (1, out_dim)
    for b in range(x_ref.shape[0]):
        x = x_ref[b]                                                 # (L, D)
        h = jnp.dot(x, w1, preferred_element_type=jnp.float32) + b1
        h = jnp.where(h >= 0, h, jnp.float32(alpha) * h)             # LeakyReLU
        y = jnp.dot(h, w2, preferred_element_type=jnp.float32) + b2
        o_ref[b] = y.astype(o_ref.dtype)


def mlp_head(x, lin_params, *, alpha):
    B, L, D = x.shape
    out_dim = lin_params["w2"].shape[1]
    Bt = _batch_block(B)
    grid = (B // Bt,)
    b1 = lin_params["b1"].reshape(1, D)
    b2 = lin_params["b2"].reshape(1, out_dim)

    def rep(shape):
        return pl.BlockSpec(shape, lambda i: (0,) * len(shape))

    return pl.pallas_call(
        functools.partial(_mlp_kernel, alpha=alpha),
        out_shape=jax.ShapeDtypeStruct((B, L, out_dim), x.dtype),
        grid_spec=pltpu.PrefetchScalarGridSpec(
            num_scalar_prefetch=0,
            grid=grid,
            in_specs=[
                pl.BlockSpec((Bt, L, D), lambda i: (i, 0, 0)),
                rep(lin_params["w1"].shape),
                rep(b1.shape),
                rep(lin_params["w2"].shape),
                rep(b2.shape),
            ],
            out_specs=pl.BlockSpec((Bt, L, out_dim), lambda i: (i, 0, 0)),
        ),
        compiler_params=pltpu.CompilerParams(
            dimension_semantics=("parallel",),
            vmem_limit_bytes=32 * 1024 * 1024),
    )(x, lin_params["w1"], b1, lin_params["w2"], b2)


# ----------------------------------------------------------------------------
# slot_hgat forward (kernel composition)
# ----------------------------------------------------------------------------
def _mask_to_bias(adj):
    # Additive attention bias, built once in the wrapper (review item 3).
    return jnp.where(adj == 0, jnp.float32(-1e9), jnp.float32(0.0))


def slot_hgat_forward(encoded_hiddens, seq_lens, adj_i, adj_s, adj_is, adj_si,
                      intent_embedding, params, *, n_heads, n_layer, alpha):
    del seq_lens  # only used as len(seq_lens)==batch in the reference
    B, L, D = encoded_hiddens.shape
    n_intent = intent_embedding.shape[0]
    d_h = D // n_heads

    h_a = jnp.broadcast_to(intent_embedding[None], (B, n_intent, D)
                           ).astype(encoded_hiddens.dtype)
    h_b = encoded_hiddens
    input_b = h_b

    bias_i = _mask_to_bias(adj_i)
    bias_s = _mask_to_bias(adj_s)
    bias_is = _mask_to_bias(adj_is)
    bias_si = _mask_to_bias(adj_si)

    for layer in range(n_layer):
        lp = params["global_graph"][layer]
        a2a = multi_head_attention(h_a, h_a, h_a, bias_i, lp["a2a"],
                                   n_head=n_heads, d_k=d_h, d_v=d_h)
        b2b = multi_head_attention(h_b, h_b, h_b, bias_s, lp["b2b"],
                                   n_head=n_heads, d_k=d_h, d_v=d_h)
        a2b = multi_head_attention(h_b, h_a, h_a, bias_is, lp["a2b"],
                                   n_head=n_heads, d_k=d_h, d_v=d_h)
        b2a = multi_head_attention(h_a, h_b, h_b, bias_si, lp["b2a"],
                                   n_head=n_heads, d_k=d_h, d_v=d_h)
        h_a = add_act(a2a, b2a, relu=True)
        h_b = add_act(b2b, a2b, relu=True)

    slot_out = add_act(input_b, h_b, relu=False)          # My_GAT residual
    slot_logits = mlp_head(slot_out, params["linear"], alpha=alpha)
    return slot_out, slot_logits


# ----------------------------------------------------------------------------
# Pure-JAX reference (mirrors the PyTorch modules, eval mode)
# ----------------------------------------------------------------------------
def _mha_reference(q, k, v, mask, p, *, n_head, d_k, d_v):
    B, Lq, D = q.shape
    Lk = k.shape[1]
    residual = q
    qh = (q @ p["w_qs"]).reshape(B, Lq, n_head, d_k).transpose(0, 2, 1, 3)
    kh = (k @ p["w_ks"]).reshape(B, Lk, n_head, d_k).transpose(0, 2, 1, 3)
    vh = (v @ p["w_vs"]).reshape(B, Lk, n_head, d_v).transpose(0, 2, 1, 3)
    attn = jnp.einsum("bhqd,bhkd->bhqk", qh / (d_k ** 0.5), kh)
    attn = jnp.where(mask[:, None, :, :] == 0, -1e9, attn)
    attn = jax.nn.softmax(attn, axis=-1)
    o = jnp.einsum("bhqk,bhkd->bhqd", attn, vh)
    o = o.transpose(0, 2, 1, 3).reshape(B, Lq, n_head * d_v)
    o = o @ p["fc"] + residual
    mean = jnp.mean(o, axis=-1, keepdims=True)
    var = jnp.mean((o - mean) ** 2, axis=-1, keepdims=True)
    o = (o - mean) * lax.rsqrt(var + 1e-6)
    return o * p["ln_gamma"] + p["ln_beta"]


def _slot_hgat_reference(encoded, intent_emb, adj_i, adj_s, adj_is, adj_si,
                         params, *, n_heads, n_layer, alpha):
    B, L, D = encoded.shape
    n_intent = intent_emb.shape[0]
    d_h = D // n_heads
    h_a = jnp.broadcast_to(intent_emb[None], (B, n_intent, D))
    h_b = encoded
    input_b = h_b
    for layer in range(n_layer):
        lp = params["global_graph"][layer]
        a2a = _mha_reference(h_a, h_a, h_a, adj_i, lp["a2a"],
                             n_head=n_heads, d_k=d_h, d_v=d_h)
        b2b = _mha_reference(h_b, h_b, h_b, adj_s, lp["b2b"],
                             n_head=n_heads, d_k=d_h, d_v=d_h)
        a2b = _mha_reference(h_b, h_a, h_a, adj_is, lp["a2b"],
                             n_head=n_heads, d_k=d_h, d_v=d_h)
        b2a = _mha_reference(h_a, h_b, h_b, adj_si, lp["b2a"],
                             n_head=n_heads, d_k=d_h, d_v=d_h)
        h_a = jnp.maximum(a2a + b2a, 0.0)
        h_b = jnp.maximum(b2b + a2b, 0.0)
    slot_out = input_b + h_b
    lin = params["linear"]
    h = slot_out @ lin["w1"] + lin["b1"]
    h = jnp.where(h >= 0, h, alpha * h)
    slot_logits = h @ lin["w2"] + lin["b2"]
    return slot_out, slot_logits


# ----------------------------------------------------------------------------
# Demo / self-test
# ----------------------------------------------------------------------------
def _make_mha_params(key, d_model, n_head, d_k, d_v, scale=0.1):
    k1, k2, k3, k4 = jax.random.split(key, 4)
    return {
        "w_qs": scale * jax.random.normal(k1, (d_model, n_head * d_k), jnp.float32),
        "w_ks": scale * jax.random.normal(k2, (d_model, n_head * d_k), jnp.float32),
        "w_vs": scale * jax.random.normal(k3, (d_model, n_head * d_v), jnp.float32),
        "fc":   scale * jax.random.normal(k4, (n_head * d_v, d_model), jnp.float32),
        "ln_gamma": jnp.ones((d_model,), jnp.float32),
        "ln_beta":  jnp.zeros((d_model,), jnp.float32),
    }


if __name__ == "__main__":
    # Small shapes consistent with the module's forward.
    B, L, D = 4, 8, 32            # batch, seq len, decoder hidden dim
    n_heads, n_layer = 4, 2
    n_intent = 8
    output_dim = 16
    alpha = 0.2
    d_h = D // n_heads

    key = jax.random.PRNGKey(0)
    keys = jax.random.split(key, 10)

    encoded = jax.random.normal(keys[0], (B, L, D), jnp.float32)
    intent_emb = jax.random.normal(keys[1], (n_intent, D), jnp.float32)
    seq_lens = [L] * B

    def rand_adj(k, shape):
        a = (jax.random.uniform(k, shape) > 0.3).astype(jnp.int32)
        return a.at[..., 0].set(1)   # guarantee >=1 unmasked key per row

    adj_i = rand_adj(keys[2], (B, n_intent, n_intent))
    adj_s = rand_adj(keys[3], (B, L, L))
    adj_is = rand_adj(keys[4], (B, L, n_intent))
    adj_si = rand_adj(keys[5], (B, n_intent, L))

    gg_params = []
    pkeys = jax.random.split(keys[6], n_layer * 4)
    for i in range(n_layer):
        gg_params.append({
            "a2a": _make_mha_params(pkeys[4 * i + 0], D, n_heads, d_h, d_h),
            "b2b": _make_mha_params(pkeys[4 * i + 1], D, n_heads, d_h, d_h),
            "a2b": _make_mha_params(pkeys[4 * i + 2], D, n_heads, d_h, d_h),
            "b2a": _make_mha_params(pkeys[4 * i + 3], D, n_heads, d_h, d_h),
        })
    lk1, lk2, lk3, lk4 = jax.random.split(keys[7], 4)
    linear = {
        "w1": 0.1 * jax.random.normal(lk1, (D, D), jnp.float32),
        "b1": 0.1 * jax.random.normal(lk2, (D,), jnp.float32),
        "w2": 0.1 * jax.random.normal(lk3, (D, output_dim), jnp.float32),
        "b2": 0.1 * jax.random.normal(lk4, (output_dim,), jnp.float32),
    }
    params = {"global_graph": gg_params, "linear": linear}

    slot_out, slot_logits = slot_hgat_forward(
        encoded, seq_lens, adj_i, adj_s, adj_is, adj_si, intent_emb, params,
        n_heads=n_heads, n_layer=n_layer, alpha=alpha)
    slot_out = jax.block_until_ready(slot_out)
    slot_logits = jax.block_until_ready(slot_logits)

    ref_out, ref_logits = _slot_hgat_reference(
        encoded, intent_emb, adj_i, adj_s, adj_is, adj_si, params,
        n_heads=n_heads, n_layer=n_layer, alpha=alpha)

    assert slot_out.shape == (B, L, D)
    assert slot_logits.shape == (B, L, output_dim)
    # Tolerance slightly loosened vs 1e-4 because the softmax denominator uses
    # the EUP approximate reciprocal (pl.reciprocal(approx=True)).
    assert jnp.allclose(slot_out, ref_out, atol=5e-3, rtol=5e-3), \
        "slot_out mismatch vs reference"
    assert jnp.allclose(slot_logits, ref_logits, atol=5e-3, rtol=5e-3), \
        "slot_logits mismatch vs reference"

    print("KERNEL_OK")
</pallas_src>

<mosaic_0001>
module attributes {stable_mosaic.version = 11 : i64} {
  func.func @_mha_kernel(%arg0: i32, %arg1: memref<2x8x32xf32, #tpu.memory_space<vmem>>, %arg2: memref<2x8x32xf32, #tpu.memory_space<vmem>>, %arg3: memref<2x8x32xf32, #tpu.memory_space<vmem>>, %arg4: memref<2x8x8xf32, #tpu.memory_space<vmem>>, %arg5: memref<32x32xf32, #tpu.memory_space<vmem>>, %arg6: memref<32x32xf32, #tpu.memory_space<vmem>>, %arg7: memref<32x32xf32, #tpu.memory_space<vmem>>, %arg8: memref<32x32xf32, #tpu.memory_space<vmem>>, %arg9: memref<1x32xf32, #tpu.memory_space<vmem>>, %arg10: memref<1x32xf32, #tpu.memory_space<vmem>>, %arg11: memref<2x8x32xf32, #tpu.memory_space<vmem>>) attributes {dimension_semantics = [#tpu.dimension_semantics<parallel>], iteration_bounds = array<i64: 2>, scalar_prefetch = 0 : i64, scratch_operands = 0 : i64, tpu.core_type = #tpu.core_type<tc>, window_params = [{transform_indices = @transform_0, window_bounds = array<i64: 2, 8, 32>}, {transform_indices = @transform_1, window_bounds = array<i64: 2, 8, 32>}, {transform_indices = @transform_2, window_bounds = array<i64: 2, 8, 32>}, {transform_indices = @transform_3, window_bounds = array<i64: 2, 8, 8>}, {pipeline_mode = #tpu.pipeline_mode<synchronous>, transform_indices = @transform_4, window_bounds = array<i64: 32, 32>}, {pipeline_mode = #tpu.pipeline_mode<synchronous>, transform_indices = @transform_5, window_bounds = array<i64: 32, 32>}, {pipeline_mode = #tpu.pipeline_mode<synchronous>, transform_indices = @transform_6, window_bounds = array<i64: 32, 32>}, {pipeline_mode = #tpu.pipeline_mode<synchronous>, transform_indices = @transform_7, window_bounds = array<i64: 32, 32>}, {pipeline_mode = #tpu.pipeline_mode<synchronous>, transform_indices = @transform_8, window_bounds = array<i64: 1, 32>}, {pipeline_mode = #tpu.pipeline_mode<synchronous>, transform_indices = @transform_9, window_bounds = array<i64: 1, 32>}, {transform_indices = @transform_10, window_bounds = array<i64: 2, 8, 32>}]} {
    %c0 = arith.constant 0 : index
    %c0_0 = arith.constant 0 : index
    %0 = vector.load %arg5[%c0, %c0_0] : memref<32x32xf32, #tpu.memory_space<vmem>>, vector<32x32xf32>
    %c0_1 = arith.constant 0 : index
    %c0_2 = arith.constant 0 : index
    %1 = vector.load %arg6[%c0_1, %c0_2] : memref<32x32xf32, #tpu.memory_space<vmem>>, vector<32x32xf32>
    %c0_3 = arith.constant 0 : index
    %c0_4 = arith.constant 0 : index
    %2 = vector.load %arg7[%c0_3, %c0_4] : memref<32x32xf32, #tpu.memory_space<vmem>>, vector<32x32xf32>
    %c0_5 = arith.constant 0 : index
    %c0_6 = arith.constant 0 : index
    %3 = vector.load %arg8[%c0_5, %c0_6] : memref<32x32xf32, #tpu.memory_space<vmem>>, vector<32x32xf32>
    %c0_7 = arith.constant 0 : index
    %c0_8 = arith.constant 0 : index
    %4 = vector.load %arg9[%c0_7, %c0_8] : memref<1x32xf32, #tpu.memory_space<vmem>>, vector<1x32xf32>
    %c0_9 = arith.constant 0 : index
    %c0_10 = arith.constant 0 : index
    %5 = vector.load %arg10[%c0_9, %c0_10] : memref<1x32xf32, #tpu.memory_space<vmem>>, vector<1x32xf32>
    %c0_11 = arith.constant 0 : index
    %c0_12 = arith.constant 0 : index
    %c0_13 = arith.constant 0 : index
    %6 = vector.load %arg1[%c0_11, %c0_12, %c0_13] : memref<2x8x32xf32, #tpu.memory_space<vmem>>, vector<1x8x32xf32>
    %7 = vector.shape_cast %6 : vector<1x8x32xf32> to vector<8x32xf32>
    %c0_14 = arith.constant 0 : index
    %c0_15 = arith.constant 0 : index
    %c0_16 = arith.constant 0 : index
    %8 = vector.load %arg2[%c0_14, %c0_15, %c0_16] : memref<2x8x32xf32, #tpu.memory_space<vmem>>, vector<1x8x32xf32>
    %9 = vector.shape_cast %8 : vector<1x8x32xf32> to vector<8x32xf32>
    %c0_17 = arith.constant 0 : index
    %c0_18 = arith.constant 0 : index
    %c0_19 = arith.constant 0 : index
    %10 = vector.load %arg3[%c0_17, %c0_18, %c0_19] : memref<2x8x32xf32, #tpu.memory_space<vmem>>, vector<1x8x32xf32>
    %11 = vector.shape_cast %10 : vector<1x8x32xf32> to vector<8x32xf32>
    %c0_20 = arith.constant 0 : index
    %c0_21 = arith.constant 0 : index
    %c0_22 = arith.constant 0 : index
    %12 = vector.load %arg4[%c0_20, %c0_21, %c0_22] : memref<2x8x8xf32, #tpu.memory_space<vmem>>, vector<1x8x8xf32>
    %13 = vector.shape_cast %12 : vector<1x8x8xf32> to vector<8x8xf32>
    %cst = arith.constant dense<0.000000e+00> : vector<8x32xf32>
    %14 = tpu.matmul %7, %0, %cst {dimension_numbers = #tpu.dot_dimension_numbers<[1], [0], [0], [1], [0, 0, 1, 1], [], []>} : vector<8x32xf32>, vector<32x32xf32>, vector<8x32xf32> -> vector<8x32xf32>
    %cst_23 = arith.constant 0.353553385 : f32
    %15 = vector.broadcast %cst_23 : f32 to vector<8x32xf32>
    %16 = arith.mulf %14, %15 : vector<8x32xf32>
    %cst_24 = arith.constant dense<0.000000e+00> : vector<8x32xf32>
    %17 = tpu.matmul %9, %1, %cst_24 {dimension_numbers = #tpu.dot_dimension_numbers<[1], [0], [0], [1], [0, 0, 1, 1], [], []>} : vector<8x32xf32>, vector<32x32xf32>, vector<8x32xf32> -> vector<8x32xf32>
    %cst_25 = arith.constant dense<0.000000e+00> : vector<8x32xf32>
    %18 = tpu.matmul %11, %2, %cst_25 {dimension_numbers = #tpu.dot_dimension_numbers<[1], [0], [0], [1], [0, 0, 1, 1], [], []>} : vector<8x32xf32>, vector<32x32xf32>, vector<8x32xf32> -> vector<8x32xf32>
    %19 = vector.extract_strided_slice %16 {offsets = [0, 0], sizes = [8, 8], strides = [1, 1]} : vector<8x32xf32> to vector<8x8xf32>
    %20 = vector.extract_strided_slice %17 {offsets = [0, 0], sizes = [8, 8], strides = [1, 1]} : vector<8x32xf32> to vector<8x8xf32>
    %21 = vector.extract_strided_slice %18 {offsets = [0, 0], sizes = [8, 8], strides = [1, 1]} : vector<8x32xf32> to vector<8x8xf32>
    %cst_26 = arith.constant dense<0.000000e+00> : vector<8x8xf32>
    %22 = tpu.matmul %19, %20, %cst_26 {dimension_numbers = #tpu.dot_dimension_numbers<[1], [1], [0], [0], [0, 0, 1, 0], [], []>} : vector<8x8xf32>, vector<8x8xf32>, vector<8x8xf32> -> vector<8x8xf32>
    %23 = arith.addf %22, %13 : vector<8x8xf32>
    %cst_27 = arith.constant dense<0xFF800000> : vector<8xf32>
    %24 = vector.multi_reduction <maximumf>, %23, %cst_27 [1] : vector<8x8xf32> to vector<8xf32>
    %25 = vector.shape_cast %24 : vector<8xf32> to vector<8x1xf32>
    %26 = vector.broadcast %25 : vector<8x1xf32> to vector<8x8xf32>
    %27 = arith.subf %23, %26 : vector<8x8xf32>
    %28 = math.exp %27 : vector<8x8xf32>
    %cst_28 = arith.constant dense<0.000000e+00> : vector<8xf32>
    %29 = vector.multi_reduction <add>, %28, %cst_28 [1] : vector<8x8xf32> to vector<8xf32>
    %30 = vector.shape_cast %29 : vector<8xf32> to vector<8x1xf32>
    %31 = tpu.reciprocal %30 {approx = true} : vector<8x1xf32> -> vector<8x1xf32>
    %32 = vector.broadcast %31 : vector<8x1xf32> to vector<8x8xf32>
    %33 = arith.mulf %28, %32 : vector<8x8xf32>
    %34 = vector.extract_strided_slice %3 {offsets = [0, 0], sizes = [8, 32], strides = [1, 1]} : vector<32x32xf32> to vector<8x32xf32>
    %cst_29 = arith.constant dense<0.000000e+00> : vector<8x32xf32>
    %35 = tpu.matmul %21, %34, %cst_29 {dimension_numbers = #tpu.dot_dimension_numbers<[1], [0], [0], [1], [0, 0, 1, 1], [], []>} : vector<8x8xf32>, vector<8x32xf32>, vector<8x32xf32> -> vector<8x32xf32>
    %cst_30 = arith.constant dense<0.000000e+00> : vector<8x32xf32>
    %36 = tpu.matmul %33, %35, %cst_30 {dimension_numbers = #tpu.dot_dimension_numbers<[1], [0], [0], [1], [0, 0, 1, 1], [], []>} : vector<8x8xf32>, vector<8x32xf32>, vector<8x32xf32> -> vector<8x32xf32>
    %37 = arith.addf %7, %36 : vector<8x32xf32>
    %38 = vector.extract_strided_slice %16 {offsets = [0, 8], sizes = [8, 8], strides = [1, 1]} : vector<8x32xf32> to vector<8x8xf32>
    %39 = vector.extract_strided_slice %17 {offsets = [0, 8], sizes = [8, 8], strides = [1, 1]} : vector<8x32xf32> to vector<8x8xf32>
    %40 = vector.extract_strided_slice %18 {offsets = [0, 8], sizes = [8, 8], strides = [1, 1]} : vector<8x32xf32> to vector<8x8xf32>
    %cst_31 = arith.constant dense<0.000000e+00> : vector<8x8xf32>
    %41 = tpu.matmul %38, %39, %cst_31 {dimension_numbers = #tpu.dot_dimension_numbers<[1], [1], [0], [0], [0, 0, 1, 0], [], []>} : vector<8x8xf32>, vector<8x8xf32>, vector<8x8xf32> -> vector<8x8xf32>
    %42 = arith.addf %41, %13 : vector<8x8xf32>
    %cst_32 = arith.constant dense<0xFF800000> : vector<8xf32>
    %43 = vector.multi_reduction <maximumf>, %42, %cst_32 [1] : vector<8x8xf32> to vector<8xf32>
    %44 = vector.shape_cast %43 : vector<8xf32> to vector<8x1xf32>
    %45 = vector.broadcast %44 : vector<8x1xf32> to vector<8x8xf32>
    %46 = arith.subf %42, %45 : vector<8x8xf32>
    %47 = math.exp %46 : vector<8x8xf32>
    %cst_33 = arith.constant dense<0.000000e+00> : vector<8xf32>
    %48 = vector.multi_reduction <add>, %47, %cst_33 [1] : vector<8x8xf32> to vector<8xf32>
    %49 = vector.shape_cast %48 : vector<8xf32> to vector<8x1xf32>
    %50 = tpu.reciprocal %49 {approx = true} : vector<8x1xf32> -> vector<8x1xf32>
    %51 = vector.broadcast %50 : vector<8x1xf32> to vector<8x8xf32>
    %52 = arith.mulf %47, %51 : vector<8x8xf32>
    %53 = vector.extract_strided_slice %3 {offsets = [8, 0], sizes = [8, 32], strides = [1, 1]} : vector<32x32xf32> to vector<8x32xf32>
    %cst_34 = arith.constant dense<0.000000e+00> : vector<8x32xf32>
    %54 = tpu.matmul %40, %53, %cst_34 {dimension_numbers = #tpu.dot_dimension_numbers<[1], [0], [0], [1], [0, 0, 1, 1], [], []>} : vector<8x8xf32>, vector<8x32xf32>, vector<8x32xf32> -> vector<8x32xf32>
    %cst_35 = arith.constant dense<0.000000e+00> : vector<8x32xf32>
    %55 = tpu.matmul %52, %54, %cst_35 {dimension_numbers = #tpu.dot_dimension_numbers<[1], [0], [0], [1], [0, 0, 1, 1], [], []>} : vector<8x8xf32>, vector<8x32xf32>, vector<8x32xf32> -> vector<8x32xf32>
    %56 = arith.addf %37, %55 : vector<8x32xf32>
    %57 = vector.extract_strided_slice %16 {offsets = [0, 16], sizes = [8, 8], strides = [1, 1]} : vector<8x32xf32> to vector<8x8xf32>
    %58 = vector.extract_strided_slice %17 {offsets = [0, 16], sizes = [8, 8], strides = [1, 1]} : vector<8x32xf32> to vector<8x8xf32>
    %59 = vector.extract_strided_slice %18 {offsets = [0, 16], sizes = [8, 8], strides = [1, 1]} : vector<8x32xf32> to vector<8x8xf32>
    %cst_36 = arith.constant dense<0.000000e+00> : vector<8x8xf32>
    %60 = tpu.matmul %57, %58, %cst_36 {dimension_numbers = #tpu.dot_dimension_numbers<[1], [1], [0], [0], [0, 0, 1, 0], [], []>} : vector<8x8xf32>, vector<8x8xf32>, vector<8x8xf32> -> vector<8x8xf32>
    %61 = arith.addf %60, %13 : vector<8x8xf32>
    %cst_37 = arith.constant dense<0xFF800000> : vector<8xf32>
    %62 = vector.multi_reduction <maximumf>, %61, %cst_37 [1] : vector<8x8xf32> to vector<8xf32>
    %63 = vector.shape_cast %62 : vector<8xf32> to vector<8x1xf32>
    %64 = vector.broadcast %63 : vector<8x1xf32> to vector<8x8xf32>
    %65 = arith.subf %61, %64 : vector<8x8xf32>
    %66 = math.exp %65 : vector<8x8xf32>
    %cst_38 = arith.constant dense<0.000000e+00> : vector<8xf32>
    %67 = vector.multi_reduction <add>, %66, %cst_38 [1] : vector<8x8xf32> to vector<8xf32>
    %68 = vector.shape_cast %67 : vector<8xf32> to vector<8x1xf32>
    %69 = tpu.reciprocal %68 {approx = true} : vector<8x1xf32> -> vector<8x1xf32>
    %70 = vector.broadcast %69 : vector<8x1xf32> to vector<8x8xf32>
    %71 = arith.mulf %66, %70 : vector<8x8xf32>
    %72 = vector.extract_strided_slice %3 {offsets = [16, 0], sizes = [8, 32], strides = [1, 1]} : vector<32x32xf32> to vector<8x32xf32>
    %cst_39 = arith.constant dense<0.000000e+00> : vector<8x32xf32>
    %73 = tpu.matmul %59, %72, %cst_39 {dimension_numbers = #tpu.dot_dimension_numbers<[1], [0], [0], [1], [0, 0, 1, 1], [], []>} : vector<8x8xf32>, vector<8x32xf32>, vector<8x32xf32> -> vector<8x32xf32>
    %cst_40 = arith.constant dense<0.000000e+00> : vector<8x32xf32>
    %74 = tpu.matmul %71, %73, %cst_40 {dimension_numbers = #tpu.dot_dimension_numbers<[1], [0], [0], [1], [0, 0, 1, 1], [], []>} : vector<8x8xf32>, vector<8x32xf32>, vector<8x32xf32> -> vector<8x32xf32>
    %75 = arith.addf %56, %74 : vector<8x32xf32>
    %76 = vector.extract_strided_slice %16 {offsets = [0, 24], sizes = [8, 8], strides = [1, 1]} : vector<8x32xf32> to vector<8x8xf32>
    %77 = vector.extract_strided_slice %17 {offsets = [0, 24], sizes = [8, 8], strides = [1, 1]} : vector<8x32xf32> to vector<8x8xf32>
    %78 = vector.extract_strided_slice %18 {offsets = [0, 24], sizes = [8, 8], strides = [1, 1]} : vector<8x32xf32> to vector<8x8xf32>
    %cst_41 = arith.constant dense<0.000000e+00> : vector<8x8xf32>
    %79 = tpu.matmul %76, %77, %cst_41 {dimension_numbers = #tpu.dot_dimension_numbers<[1], [1], [0], [0], [0, 0, 1, 0], [], []>} : vector<8x8xf32>, vector<8x8xf32>, vector<8x8xf32> -> vector<8x8xf32>
    %80 = arith.addf %79, %13 : vector<8x8xf32>
    %cst_42 = arith.constant dense<0xFF800000> : vector<8xf32>
    %81 = vector.multi_reduction <maximumf>, %80, %cst_42 [1] : vector<8x8xf32> to vector<8xf32>
    %82 = vector.shape_cast %81 : vector<8xf32> to vector<8x1xf32>
    %83 = vector.broadcast %82 : vector<8x1xf32> to vector<8x8xf32>
    %84 = arith.subf %80, %83 : vector<8x8xf32>
    %85 = math.exp %84 : vector<8x8xf32>
    %cst_43 = arith.constant dense<0.000000e+00> : vector<8xf32>
    %86 = vector.multi_reduction <add>, %85, %cst_43 [1] : vector<8x8xf32> to vector<8xf32>
    %87 = vector.shape_cast %86 : vector<8xf32> to vector<8x1xf32>
    %88 = tpu.reciprocal %87 {approx = true} : vector<8x1xf32> -> vector<8x1xf32>
    %89 = vector.broadcast %88 : vector<8x1xf32> to vector<8x8xf32>
    %90 = arith.mulf %85, %89 : vector<8x8xf32>
    %91 = vector.extract_strided_slice %3 {offsets = [24, 0], sizes = [8, 32], strides = [1, 1]} : vector<32x32xf32> to vector<8x32xf32>
    %cst_44 = arith.constant dense<0.000000e+00> : vector<8x32xf32>
    %92 = tpu.matmul %78, %91, %cst_44 {dimension_numbers = #tpu.dot_dimension_numbers<[1], [0], [0], [1], [0, 0, 1, 1], [], []>} : vector<8x8xf32>, vector<8x32xf32>, vector<8x32xf32> -> vector<8x32xf32>
    %cst_45 = arith.constant dense<0.000000e+00> : vector<8x32xf32>
    %93 = tpu.matmul %90, %92, %cst_45 {dimension_numbers = #tpu.dot_dimension_numbers<[1], [0], [0], [1], [0, 0, 1, 1], [], []>} : vector<8x8xf32>, vector<8x32xf32>, vector<8x32xf32> -> vector<8x32xf32>
    %94 = arith.addf %75, %93 : vector<8x32xf32>
    %cst_46 = arith.constant dense<0.000000e+00> : vector<8xf32>
    %95 = vector.multi_reduction <add>, %94, %cst_46 [1] : vector<8x32xf32> to vector<8xf32>
    %96 = vector.shape_cast %95 : vector<8xf32> to vector<8x1xf32>
    %cst_47 = arith.constant 3.200000e+01 : f32
    %97 = vector.broadcast %cst_47 : f32 to vector<8x1xf32>
    %98 = arith.divf %96, %97 : vector<8x1xf32>
    %99 = vector.broadcast %98 : vector<8x1xf32> to vector<8x32xf32>
    %100 = arith.subf %94, %99 : vector<8x32xf32>
    %101 = arith.mulf %100, %100 : vector<8x32xf32>
    %cst_48 = arith.constant dense<0.000000e+00> : vector<8xf32>
    %102 = vector.multi_reduction <add>, %101, %cst_48 [1] : vector<8x32xf32> to vector<8xf32>
    %103 = vector.shape_cast %102 : vector<8xf32> to vector<8x1xf32>
    %cst_49 = arith.constant 3.200000e+01 : f32
    %104 = vector.broadcast %cst_49 : f32 to vector<8x1xf32>
    %105 = arith.divf %103, %104 : vector<8x1xf32>
    %106 = vector.broadcast %98 : vector<8x1xf32> to vector<8x32xf32>
    %107 = arith.subf %94, %106 : vector<8x32xf32>
    %cst_50 = arith.constant 9.99999997E-7 : f32
    %108 = vector.broadcast %cst_50 : f32 to vector<8x1xf32>
    %109 = arith.addf %105, %108 : vector<8x1xf32>
    %110 = math.rsqrt %109 : vector<8x1xf32>
    %111 = vector.broadcast %110 : vector<8x1xf32> to vector<8x32xf32>
    %112 = arith.mulf %107, %111 : vector<8x32xf32>
    %113 = vector.broadcast %4 : vector<1x32xf32> to vector<8x32xf32>
    %114 = arith.mulf %112, %113 : vector<8x32xf32>
    %115 = vector.broadcast %5 : vector<1x32xf32> to vector<8x32xf32>
    %116 = arith.addf %114, %115 : vector<8x32xf32>
    %c0_51 = arith.constant 0 : index
    %c0_52 = arith.constant 0 : index
    %c0_53 = arith.constant 0 : index
    %117 = vector.load %arg11[%c0_51, %c0_52, %c0_53] : memref<2x8x32xf32, #tpu.memory_space<vmem>>, vector<1x8x32xf32>
    %118 = vector.shape_cast %117 : vector<1x8x32xf32> to vector<8x32xf32>
    %119 = vector.shape_cast %116 : vector<8x32xf32> to vector<1x8x32xf32>
    tpu.vector_store %arg11[%c0_51, %c0_52, %c0_53], %119 {strides = array<i32>} : memref<2x8x32xf32, #tpu.memory_space<vmem>>, vector<1x8x32xf32>,
    %c1 = arith.constant 1 : index
    %c0_54 = arith.constant 0 : index
    %c0_55 = arith.constant 0 : index
    %120 = vector.load %arg1[%c1, %c0_54, %c0_55] : memref<2x8x32xf32, #tpu.memory_space<vmem>>, vector<1x8x32xf32>
    %121 = vector.shape_cast %120 : vector<1x8x32xf32> to vector<8x32xf32>
    %c1_56 = arith.constant 1 : index
    %c0_57 = arith.constant 0 : index
    %c0_58 = arith.constant 0 : index
    %122 = vector.load %arg2[%c1_56, %c0_57, %c0_58] : memref<2x8x32xf32, #tpu.memory_space<vmem>>, vector<1x8x32xf32>
    %123 = vector.shape_cast %122 : vector<1x8x32xf32> to vector<8x32xf32>
    %c1_59 = arith.constant 1 : index
    %c0_60 = arith.constant 0 : index
    %c0_61 = arith.constant 0 : index
    %124 = vector.load %arg3[%c1_59, %c0_60, %c0_61] : memref<2x8x32xf32, #tpu.memory_space<vmem>>, vector<1x8x32xf32>
    %125 = vector.shape_cast %124 : vector<1x8x32xf32> to vector<8x32xf32>
    %c1_62 = arith.constant 1 : index
    %c0_63 = arith.constant 0 : index
    %c0_64 = arith.constant 0 : index
    %126 = vector.load %arg4[%c1_62, %c0_63, %c0_64] : memref<2x8x8xf32, #tpu.memory_space<vmem>>, vector<1x8x8xf32>
    %127 = vector.shape_cast %126 : vector<1x8x8xf32> to vector<8x8xf32>
    %cst_65 = arith.constant dense<0.000000e+00> : vector<8x32xf32>
    %128 = tpu.matmul %121, %0, %cst_65 {dimension_numbers = #tpu.dot_dimension_numbers<[1], [0], [0], [1], [0, 0, 1, 1], [], []>} : vector<8x32xf32>, vector<32x32xf32>, vector<8x32xf32> -> vector<8x32xf32>
    %cst_66 = arith.constant 0.353553385 : f32
    %129 = vector.broadcast %cst_66 : f32 to vector<8x32xf32>
    %130 = arith.mulf %128, %129 : vector<8x32xf32>
    %cst_67 = arith.constant dense<0.000000e+00> : vector<8x32xf32>
    %131 = tpu.matmul %123, %1, %cst_67 {dimension_numbers = #tpu.dot_dimension_numbers<[1], [0], [0], [1], [0, 0, 1, 1], [], []>} : vector<8x32xf32>, vector<32x32xf32>, vector<8x32xf32> -> vector<8x32xf32>
    %cst_68 = arith.constant dense<0.000000e+00> : vector<8x32xf32>
    %132 = tpu.matmul %125, %2, %cst_68 {dimension_numbers = #tpu.dot_dimension_numbers<[1], [0], [0], [1], [0, 0, 1, 1], [], []>} : vector<8x32xf32>, vector<32x32xf32>, vector<8x32xf32> -> vector<8x32xf32>
    %133 = vector.extract_strided_slice %130 {offsets = [0, 0], sizes = [8, 8], strides = [1, 1]} : vector<8x32xf32> to vector<8x8xf32>
    %134 = vector.extract_strided_slice %131 {offsets = [0, 0], sizes = [8, 8], strides = [1, 1]} : vector<8x32xf32> to vector<8x8xf32>
    %135 = vector.extract_strided_slice %132 {offsets = [0, 0], sizes = [8, 8], strides = [1, 1]} : vector<8x32xf32> to vector<8x8xf32>
    %cst_69 = arith.constant dense<0.000000e+00> : vector<8x8xf32>
    %136 = tpu.matmul %133, %134, %cst_69 {dimension_numbers = #tpu.dot_dimension_numbers<[1], [1], [0], [0], [0, 0, 1, 0], [], []>} : vector<8x8xf32>, vector<8x8xf32>, vector<8x8xf32> -> vector<8x8xf32>
    %137 = arith.addf %136, %127 : vector<8x8xf32>
    %cst_70 = arith.constant dense<0xFF800000> : vector<8xf32>
    %138 = vector.multi_reduction <maximumf>, %137, %cst_70 [1] : vector<8x8xf32> to vector<8xf32>
    %139 = vector.shape_cast %138 : vector<8xf32> to vector<8x1xf32>
    %140 = vector.broadcast %139 : vector<8x1xf32> to vector<8x8xf32>
    %141 = arith.subf %137, %140 : vector<8x8xf32>
    %142 = math.exp %141 : vector<8x8xf32>
    %cst_71 = arith.constant dense<0.000000e+00> : vector<8xf32>
    %143 = vector.multi_reduction <add>, %142, %cst_71 [1] : vector<8x8xf32> to vector<8xf32>
    %144 = vector.shape_cast %143 : vector<8xf32> to vector<8x1xf32>
    %145 = tpu.reciprocal %144 {approx = true} : vector<8x1xf32> -> vector<8x1xf32>
    %146 = vector.broadcast %145 : vector<8x1xf32> to vector<8x8xf32>
    %147 = arith.mulf %142, %146 : vector<8x8xf32>
    %148 = vector.extract_strided_slice %3 {offsets = [0, 0], sizes = [8, 32], strides = [1, 1]} : vector<32x32xf32> to vector<8x32xf32>
    %cst_72 = arith.constant dense<0.000000e+00> : vector<8x32xf32>
    %149 = tpu.matmul %135, %148, %cst_72 {dimension_numbers = #tpu.dot_dimension_numbers<[1], [0], [0], [1], [0, 0, 1, 1], [], []>} : vector<8x8xf32>, vector<8x32xf32>, vector<8x32xf32> -> vector<8x32xf32>
    %cst_73 = arith.constant dense<0.000000e+00> : vector<8x32xf32>
    %150 = tpu.matmul %147, %149, %cst_73 {dimension_numbers = #tpu.dot_dimension_numbers<[1], [0], [0], [1], [0, 0, 1, 1], [], []>} : vector<8x8xf32>, vector<8x32xf32>, vector<8x32xf32> -> vector<8x32xf32>
    %151 = arith.addf %121, %150 : vector<8x32xf32>
    %152 = vector.extract_strided_slice %130 {offsets = [0, 8], sizes = [8, 8], strides = [1, 1]} : vector<8x32xf32> to vector<8x8xf32>
    %153 = vector.extract_strided_slice %131 {offsets = [0, 8], sizes = [8, 8], strides = [1, 1]} : vector<8x32xf32> to vector<8x8xf32>
    %154 = vector.extract_strided_slice %132 {offsets = [0, 8], sizes = [8, 8], strides = [1, 1]} : vector<8x32xf32> to vector<8x8xf32>
    %cst_74 = arith.constant dense<0.000000e+00> : vector<8x8xf32>
    %155 = tpu.matmul %152, %153, %cst_74 {dimension_numbers = #tpu.dot_dimension_numbers<[1], [1], [0], [0], [0, 0, 1, 0], [], []>} : vector<8x8xf32>, vector<8x8xf32>, vector<8x8xf32> -> vector<8x8xf32>
    %156 = arith.addf %155, %127 : vector<8x8xf32>
    %cst_75 = arith.constant dense<0xFF800000> : vector<8xf32>
    %157 = vector.multi_reduction <maximumf>, %156, %cst_75 [1] : vector<8x8xf32> to vector<8xf32>
    %158 = vector.shape_cast %157 : vector<8xf32> to vector<8x1xf32>
    %159 = vector.broadcast %158 : vector<8x1xf32> to vector<8x8xf32>
    %160 = arith.subf %156, %159 : vector<8x8xf32>
    %161 = math.exp %160 : vector<8x8xf32>
    %cst_76 = arith.constant dense<0.000000e+00> : vector<8xf32>
    %162 = vector.multi_reduction <add>, %161, %cst_76 [1] : vector<8x8xf32> to vector<8xf32>
    %163 = vector.shape_cast %162 : vector<8xf32> to vector<8x1xf32>
    %164 = tpu.reciprocal %163 {approx = true} : vector<8x1xf32> -> vector<8x1xf32>
    %165 = vector.broadcast %164 : vector<8x1xf32> to vector<8x8xf32>
    %166 = arith.mulf %161, %165 : vector<8x8xf32>
    %167 = vector.extract_strided_slice %3 {offsets = [8, 0], sizes = [8, 32], strides = [1, 1]} : vector<32x32xf32> to vector<8x32xf32>
    %cst_77 = arith.constant dense<0.000000e+00> : vector<8x32xf32>
    %168 = tpu.matmul %154, %167, %cst_77 {dimension_numbers = #tpu.dot_dimension_numbers<[1], [0], [0], [1], [0, 0, 1, 1], [], []>} : vector<8x8xf32>, vector<8x32xf32>, vector<8x32xf32> -> vector<8x32xf32>
    %cst_78 = arith.constant dense<0.000000e+00> : vector<8x32xf32>
    %169 = tpu.matmul %166, %168, %cst_78 {dimension_numbers = #tpu.dot_dimension_numbers<[1], [0], [0], [1], [0, 0, 1, 1], [], []>} : vector<8x8xf32>, vector<8x32xf32>, vector<8x32xf32> -> vector<8x32xf32>
    %170 = arith.addf %151, %169 : vector<8x32xf32>
    %171 = vector.extract_strided_slice %130 {offsets = [0, 16], sizes = [8, 8], strides = [1, 1]} : vector<8x32xf32> to vector<8x8xf32>
    %172 = vector.extract_strided_slice %131 {offsets = [0, 16], sizes = [8, 8], strides = [1, 1]} : vector<8x32xf32> to vector<8x8xf32>
    %173 = vector.extract_strided_slice %132 {offsets = [0, 16], sizes = [8, 8], strides = [1, 1]} : vector<8x32xf32> to vector<8x8xf32>
    %cst_79 = arith.constant dense<0.000000e+00> : vector<8x8xf32>
    %174 = tpu.matmul %171, %172, %cst_79 {dimension_numbers = #tpu.dot_dimension_numbers<[1], [1], [0], [0], [0, 0, 1, 0], [], []>} : vector<8x8xf32>, vector<8x8xf32>, vector<8x8xf32> -> vector<8x8xf32>
    %175 = arith.addf %174, %127 : vector<8x8xf32>
    %cst_80 = arith.constant dense<0xFF800000> : vector<8xf32>
    %176 = vector.multi_reduction <maximumf>, %175, %cst_80 [1] : vector<8x8xf32> to vector<8xf32>
    %177 = vector.shape_cast %176 : vector<8xf32> to vector<8x1xf32>
    %178 = vector.broadcast %177 : vector<8x1xf32> to vector<8x8xf32>
    %179 = arith.subf %175, %178 : vector<8x8xf32>
    %180 = math.exp %179 : vector<8x8xf32>
    %cst_81 = arith.constant dense<0.000000e+00> : vector<8xf32>
    %181 = vector.multi_reduction <add>, %180, %cst_81 [1] : vector<8x8xf32> to vector<8xf32>
    %182 = vector.shape_cast %181 : vector<8xf32> to vector<8x1xf32>
    %183 = tpu.reciprocal %182 {approx = true} : vector<8x1xf32> -> vector<8x1xf32>
    %184 = vector.broadcast %183 : vector<8x1xf32> to vector<8x8xf32>
    %185 = arith.mulf %180, %184 : vector<8x8xf32>
    %186 = vector.extract_strided_slice %3 {offsets = [16, 0], sizes = [8, 32], strides = [1, 1]} : vector<32x32xf32> to vector<8x32xf32>
    %cst_82 = arith.constant dense<0.000000e+00> : vector<8x32xf32>
    %187 = tpu.matmul %173, %186, %cst_82 {dimension_numbers = #tpu.dot_dimension_numbers<[1], [0], [0], [1], [0, 0, 1, 1], [], []>} : vector<8x8xf32>, vector<8x32xf32>, vector<8x32xf32> -> vector<8x32xf32>
    %cst_83 = arith.constant dense<0.000000e+00> : vector<8x32xf32>
    %188 = tpu.matmul %185, %187, %cst_83 {dimension_numbers = #tpu.dot_dimension_numbers<[1], [0], [0], [1], [0, 0, 1, 1], [], []>} : vector<8x8xf32>, vector<8x32xf32>, vector<8x32xf32> -> vector<8x32xf32>
    %189 = arith.addf %170, %188 : vector<8x32xf32>
    %190 = vector.extract_strided_slice %130 {offsets = [0, 24], sizes = [8, 8], strides = [1, 1]} : vector<8x32xf32> to vector<8x8xf32>
    %191 = vector.extract_strided_slice %131 {offsets = [0, 24], sizes = [8, 8], strides = [1, 1]} : vector<8x32xf32> to vector<8x8xf32>
    %192 = vector.extract_strided_slice %132 {offsets = [0, 24], sizes = [8, 8], strides = [1, 1]} : vector<8x32xf32> to vector<8x8xf32>
    %cst_84 = arith.constant dense<0.000000e+00> : vector<8x8xf32>
    %193 = tpu.matmul %190, %191, %cst_84 {dimension_numbers = #tpu.dot_dimension_numbers<[1], [1], [0], [0], [0, 0, 1, 0], [], []>} : vector<8x8xf32>, vector<8x8xf32>, vector<8x8xf32> -> vector<8x8xf32>
    %194 = arith.addf %193, %127 : vector<8x8xf32>
    %cst_85 = arith.constant dense<0xFF800000> : vector<8xf32>
    %195 = vector.multi_reduction <maximumf>, %194, %cst_85 [1] : vector<8x8xf32> to vector<8xf32>
    %196 = vector.shape_cast %195 : vector<8xf32> to vector<8x1xf32>
    %197 = vector.broadcast %196 : vector<8x1xf32> to vector<8x8xf32>
    %198 = arith.subf %194, %197 : vector<8x8xf32>
    %199 = math.exp %198 : vector<8x8xf32>
    %cst_86 = arith.constant dense<0.000000e+00> : vector<8xf32>
    %200 = vector.multi_reduction <add>, %199, %cst_86 [1] : vector<8x8xf32> to vector<8xf32>
    %201 = vector.shape_cast %200 : vector<8xf32> to vector<8x1xf32>
    %202 = tpu.reciprocal %201 {approx = true} : vector<8x1xf32> -> vector<8x1xf32>
    %203 = vector.broadcast %202 : vector<8x1xf32> to vector<8x8xf32>
    %204 = arith.mulf %199, %203 : vector<8x8xf32>
    %205 = vector.extract_strided_slice %3 {offsets = [24, 0], sizes = [8, 32], strides = [1, 1]} : vector<32x32xf32> to vector<8x32xf32>
    %cst_87 = arith.constant dense<0.000000e+00> : vector<8x32xf32>
    %206 = tpu.matmul %192, %205, %cst_87 {dimension_numbers = #tpu.dot_dimension_numbers<[1], [0], [0], [1], [0, 0, 1, 1], [], []>} : vector<8x8xf32>, vector<8x32xf32>, vector<8x32xf32> -> vector<8x32xf32>
    %cst_88 = arith.constant dense<0.000000e+00> : vector<8x32xf32>
    %207 = tpu.matmul %204, %206, %cst_88 {dimension_numbers = #tpu.dot_dimension_numbers<[1], [0], [0], [1], [0, 0, 1, 1], [], []>} : vector<8x8xf32>, vector<8x32xf32>, vector<8x32xf32> -> vector<8x32xf32>
    %208 = arith.addf %189, %207 : vector<8x32xf32>
    %cst_89 = arith.constant dense<0.000000e+00> : vector<8xf32>
    %209 = vector.multi_reduction <add>, %208, %cst_89 [1] : vector<8x32xf32> to vector<8xf32>
    %210 = vector.shape_cast %209 : vector<8xf32> to vector<8x1xf32>
    %cst_90 = arith.constant 3.200000e+01 : f32
    %211 = vector.broadcast %cst_90 : f32 to vector<8x1xf32>
    %212 = arith.divf %210, %211 : vector<8x1xf32>
    %213 = vector.broadcast %212 : vector<8x1xf32> to vector<8x32xf32>
    %214 = arith.subf %208, %213 : vector<8x32xf32>
    %215 = arith.mulf %214, %214 : vector<8x32xf32>
    %cst_91 = arith.constant dense<0.000000e+00> : vector<8xf32>
    %216 = vector.multi_reduction <add>, %215, %cst_91 [1] : vector<8x32xf32> to vector<8xf32>
    %217 = vector.shape_cast %216 : vector<8xf32> to vector<8x1xf32>
    %cst_92 = arith.constant 3.200000e+01 : f32
    %218 = vector.broadcast %cst_92 : f32 to vector<8x1xf32>
    %219 = arith.divf %217, %218 : vector<8x1xf32>
    %220 = vector.broadcast %212 : vector<8x1xf32> to vector<8x32xf32>
    %221 = arith.subf %208, %220 : vector<8x32xf32>
    %cst_93 = arith.constant 9.99999997E-7 : f32
    %222 = vector.broadcast %cst_93 : f32 to vector<8x1xf32>
    %223 = arith.addf %219, %222 : vector<8x1xf32>
    %224 = math.rsqrt %223 : vector<8x1xf32>
    %225 = vector.broadcast %224 : vector<8x1xf32> to vector<8x32xf32>
    %226 = arith.mulf %221, %225 : vector<8x32xf32>
    %227 = vector.broadcast %4 : vector<1x32xf32> to vector<8x32xf32>
    %228 = arith.mulf %226, %227 : vector<8x32xf32>
    %229 = vector.broadcast %5 : vector<1x32xf32> to vector<8x32xf32>
    %230 = arith.addf %228, %229 : vector<8x32xf32>
    %c1_94 = arith.constant 1 : index
    %c0_95 = arith.constant 0 : index
    %c0_96 = arith.constant 0 : index
    %231 = vector.load %arg11[%c1_94, %c0_95, %c0_96] : memref<2x8x32xf32, #tpu.memory_space<vmem>>, vector<1x8x32xf32>
    %232 = vector.shape_cast %231 : vector<1x8x32xf32> to vector<8x32xf32>
    %233 = vector.shape_cast %230 : vector<8x32xf32> to vector<1x8x32xf32>
    tpu.vector_store %arg11[%c1_94, %c0_95, %c0_96], %233 {strides = array<i32>} : memref<2x8x32xf32, #tpu.memory_space<vmem>>, vector<1x8x32xf32>,
    return
  }
  func.func @transform_0(%arg0: i32) -> (i32, i32, i32) {
    %c0_i32 = arith.constant 0 : i32
    %c0_i32_0 = arith.constant 0 : i32
    %c0_i32_1 = arith.constant 0 : i32
    return %arg0, %c0_i32, %c0_i32_0 : i32, i32, i32
  }
  func.func @transform_1(%arg0: i32) -> (i32, i32, i32) {
    %c0_i32 = arith.constant 0 : i32
    %c0_i32_0 = arith.constant 0 : i32
    %c0_i32_1 = arith.constant 0 : i32
    return %arg0, %c0_i32, %c0_i32_0 : i32, i32, i32
  }
  func.func @transform_2(%arg0: i32) -> (i32, i32, i32) {
    %c0_i32 = arith.constant 0 : i32
    %c0_i32_0 = arith.constant 0 : i32
    %c0_i32_1 = arith.constant 0 : i32
    return %arg0, %c0_i32, %c0_i32_0 : i32, i32, i32
  }
  func.func @transform_3(%arg0: i32) -> (i32, i32, i32) {
    %c0_i32 = arith.constant 0 : i32
    %c0_i32_0 = arith.constant 0 : i32
    %c0_i32_1 = arith.constant 0 : i32
    return %arg0, %c0_i32, %c0_i32_0 : i32, i32, i32
  }
  func.func @transform_4(%arg0: i32) -> (i32, i32) {
    %c0_i32 = arith.constant 0 : i32
    %c0_i32_0 = arith.constant 0 : i32
    %c0_i32_1 = arith.constant 0 : i32
    return %c0_i32, %c0_i32_0 : i32, i32
  }
  func.func @transform_5(%arg0: i32) -> (i32, i32) {
    %c0_i32 = arith.constant 0 : i32
    %c0_i32_0 = arith.constant 0 : i32
    %c0_i32_1 = arith.constant 0 : i32
    return %c0_i32, %c0_i32_0 : i32, i32
  }
  func.func @transform_6(%arg0: i32) -> (i32, i32) {
    %c0_i32 = arith.constant 0 : i32
    %c0_i32_0 = arith.constant 0 : i32
    %c0_i32_1 = arith.constant 0 : i32
    return %c0_i32, %c0_i32_0 : i32, i32
  }
  func.func @transform_7(%arg0: i32) -> (i32, i32) {
    %c0_i32 = arith.constant 0 : i32
    %c0_i32_0 = arith.constant 0 : i32
    %c0_i32_1 = arith.constant 0 : i32
    return %c0_i32, %c0_i32_0 : i32, i32
  }
  func.func @transform_8(%arg0: i32) -> (i32, i32) {
    %c0_i32 = arith.constant 0 : i32
    %c0_i32_0 = arith.constant 0 : i32
    %c0_i32_1 = arith.constant 0 : i32
    return %c0_i32, %c0_i32_0 : i32, i32
  }
  func.func @transform_9(%arg0: i32) -> (i32, i32) {
    %c0_i32 = arith.constant 0 : i32
    %c0_i32_0 = arith.constant 0 : i32
    %c0_i32_1 = arith.constant 0 : i32
    return %c0_i32, %c0_i32_0 : i32, i32
  }
  func.func @transform_10(%arg0: i32) -> (i32, i32, i32) {
    %c0_i32 = arith.constant 0 : i32
    %c0_i32_0 = arith.constant 0 : i32
    %c0_i32_1 = arith.constant 0 : i32
    return %arg0, %c0_i32, %c0_i32_0 : i32, i32, i32
  }
}

</mosaic_0001>

<bundles_post_ra>
// kernel: tpu_custom_call.1
= control target key start
LH: loop header
LB: loop body
LE: loop exit
PB: predicated region body
PF: predicated region fallthrough
CT: control target
= control target key end

     0   :  { %s4797_s0 = inlined_call_operand.hbm [shape: f32[4,8,32], index: 0, kind: input, shape index: {}]   ;;  %s4798_s1 = inlined_call_operand.hbm [shape: f32[4,8,32], index: 1, kind: input, shape index: {}]   ;;  %s4799_s2 = inlined_call_operand.hbm [shape: f32[4,8,32], index: 2, kind: input, shape index: {}]   ;;  %s4800_s3 = inlined_call_operand.hbm [shape: f32[4,8,8], index: 3, kind: input, shape index: {}]   ;;  %s4801_s4 = inlined_call_operand.hbm [shape: f32[32,32], index: 4, kind: input, shape index: {}]   ;;  %s4802_s5 = inlined_call_operand.hbm [shape: f32[32,32], index: 5, kind: input, shape index: {}]   ;;  %s4803_s6 = inlined_call_operand.hbm [shape: f32[32,32], index: 6, kind: input, shape index: {}]   ;;  %s4804_s7 = inlined_call_operand.hbm [shape: f32[32,32], index: 7, kind: input, shape index: {}]   ;;  %s4805_s8 = inlined_call_operand.vmem [shape: f32[1,32], index: 8, kind: input, shape index: {}]   ;;  %s4806_s9 = inlined_call_operand.vmem [shape: f32[1,32], index: 9, kind: input, shape index: {}]   ;;  %s4807_s10 = inlined_call_operand.hbm [shape: f32[4,8,32], index: 10, kind: output, shape index: {}]  }
   0x1   :  { %4837 = sst [smem:[#allocation31_spill]] %s4798_s1 }
   0x2   :  { %4838 = sst [smem:[#allocation32_spill]] %s4801_s4 }
   0x3   :  { %4839 = sst [smem:[#allocation33_spill]] %s4802_s5 }
   0x4   :  { %4840 = sst [smem:[#allocation34_spill]] %s4805_s8 }
   0x5   :  { %4841 = sst [smem:[#allocation35_spill]] %s4806_s9 }
   0x6   :  { %4842 = sst [smem:[#allocation36_spill]] %s4807_s10 }
   0x7   :  { %15 = vsyncpa [#allocation3], 0 }
   0x8   :  { %17 = vsyncpa [#allocation3 + $0x1], 0 }
   0x9   :  { %18 = vsyncpa [#allocation6], 0 }
   0xa   :  { %20 = vsyncpa [#allocation6 + $0x1], 0 }
   0xb   :  { %21 = vsyncpa [#allocation9], 0 }
   0xc   :  { %23 = vsyncpa [#allocation9 + $0x1], 0 }
   0xd   :  { %24 = vsyncpa [#allocation12], 0 }
   0xe   :  { %25 = vsyncpa [#allocation15], 0 }
   0xf   :  { %26 = vsyncpa [#allocation4], 0 }
  0x10   :  { %28 = vsyncpa [#allocation4 + $0x1], 0  ;;  %s4096_s13 = smov 0   ;;  %s4098_s14 = smov 0  }
  0x11   :  { %s4100_s15 = smov 0   ;;  %s4102_s16 = smov 0  }
  0x12 LB: > { %4843 = sst [smem:[#allocation24_spill]] %s4008_s13  ;;  %s4117_s17 = sadd.s32 4294967295, %s4020_s16   ;;  %s4020_s16 = sphi %s4102_s16, %s4889_s16   ;;  %s4016_s15 = sphi %s4100_s15, %s4893_s15   ;;  %s4012_s14 = sphi %s4098_s14, %s4892_s14   ;;  %s4008_s13 = sphi %s4096_s13, %s4891_s13  }
  0x13   : > { %4844 = sst [smem:[#allocation25_spill]] %s4117_s17  ;;  %s3157_s18 = sadd.s32 4294967294, %s4020_s16  }
  0x14   : > { %p54_p0 = scmp.ne.s32.totalorder %s4012_s14, %s4008_s13  ;;  %p4808_p1 = scmp.eq.s32.totalorder %s4117_s17, 0 }
  0x15   : > { %p288_p3 = scmp.eq.s32.totalorder %s3157_s18, 1  ;;  %p3158_p5 = scmp.ge.s32.totalorder %s4020_s16, 1 }
  0x16   : > { %p4126_p4 = por %p4808_p1, %p54_p0  ;;  %p295_p7 = scmp.lt.s32.totalorder %s4020_s16, 3 }
  0x17   : > { %p4131_p6 = por %p288_p3, %p54_p0  ;;  %s4022_s22 = smov [#allocation10]  }
  0x18   : > { %s4845_s19 = scalar_select %p4126_p4, 1, 0 }
  0x19   : > { %s4847_s20 = scalar_select %p4131_p6, 1, 0 }
  0x1a   : > { %4846 = sst [smem:[#allocation26_spill]] %s4845_s19  ;;  %p4136_p8 = pnand %p3158_p5, %p295_p7 }
  0x1b   : > { %4848 = sst [smem:[#allocation27_spill]] %s4847_s20  ;;  %s307_s23 = sshll.u32 %s4022_s22, 4  ;;  %s4140_s23 = int_to_ptr.vmem [resolvable:$true] %s307_s23 }
  0x1c   : > { %s4849_s21 = scalar_select %p4136_p8, 1, 0 }
  0x1d   : > { %p3580_p9 = pneg %p4136_p8  ;;  %s4023_s25 = smov [#allocation11]  }
  0x1e   : > { %s320_s26 = sshll.u32 %s4023_s25, 4  ;;  %s4851_s4 = sld [smem:[#allocation32_spill]]  ;;  %s4151_s26 = int_to_ptr.vmem [resolvable:$true] %s320_s26 }
  0x1f   : > { %p4147_p11 = pnand %p3580_p9, %p4808_p1 }
  0x21   : > { %s4850_s24 = scalar_select %p4147_p11, 1, 0 }
  0x22   : > { %p4161_p13 = pneg %p4147_p11 }
  0x24   : > { %s3702_s29 = scalar_lea.hbm %s4851_s4, 512 }
  0x25   : > { %p3703_p12 = scmp.ne.s32.totalorder %s4851_s4, %s3702_s29  ;;  %p3709_p5 = scmp.lt.u32.totalorder %s3702_s29, %s4851_s4 }
  0x26   : > { %s4852_s12 = scalar_select %p4161_p13, 1, 0 }
  0x27   : > { %p3705_p0 = pnand %p4161_p13, %p3703_p12 }
  0x29   : > { %p3706_p3 = pneg %p3705_p0 }
  0x2b   : > { %p3711_p7 = pnand %p3709_p5, %p3706_p3 }
  0x2d   : > { %3714 = shalt.err (!%p3711_p7)
}
  0x2e   : > { %s3715_s25 = scalar_lea.vmem %s4140_s23, 512  ;;  %p3723_p2 = scmp.lt.s32.totalorder %s4140_s23, %s4140_s23 }
  0x2f   : > { %p3716_p9 = scmp.ne.s32.totalorder %s4140_s23, %s3715_s25  ;;  %p3724_p6 = scmp.lt.s32.totalorder %s3715_s25, %s3715_s25 }
  0x31   : > { %p3718_p10 = pnand %p3716_p9, %p4161_p13  ;;  %p3725_p12 = por %p3724_p6, %p3723_p2 }
  0x33   : > { %p3719_p1 = pneg %p3718_p10 }
  0x35   : > { %p3726_p0 = pnand %p3725_p12, %p3719_p1 }
  0x37   : > { %3729 = shalt.err (!%p3726_p0)
}
  0x38   : > { %s4813_s27 = smov 128   ;;  %s4815_s28 = smov 8  }
  0x39   : > { %3583 = dma.hbm_to_vmem [thread:$0]  (!%p4147_p11), %s4851_s4, 512, %s4140_s23, [#allocation9], %s4813_s27, %s4813_s27, %s4815_s28  }
  0x3a   : > { %s4853_s5 = sld [smem:[#allocation33_spill]] }
  0x40   : > { %s3730_s22 = scalar_lea.hbm %s4853_s5, 512 }
  0x41   : > { %p3731_p1 = scmp.ne.s32.totalorder %s4853_s5, %s3730_s22  ;;  %p3737_p10 = scmp.lt.u32.totalorder %s3730_s22, %s4853_s5 }
  0x43   : > { %p3733_p2 = pnand %p3731_p1, %p4161_p13 }
  0x45   : > { %p3734_p6 = pneg %p3733_p2 }
  0x47   : > { %p3739_p3 = pnand %p3737_p10, %p3734_p6 }
  0x49   : > { %3742 = shalt.err (!%p3739_p3)
}
  0x4a   : > { %s3743_s23 = scalar_lea.vmem %s4151_s26, 512  ;;  %p3751_p12 = scmp.lt.s32.totalorder %s4151_s26, %s4151_s26 }
  0x4b   : > { %p3744_p5 = scmp.ne.s32.totalorder %s4151_s26, %s3743_s23  ;;  %p3752_p0 = scmp.lt.s32.totalorder %s3743_s23, %s3743_s23 }
  0x4d   : > { %p3746_p7 = pnand %p3744_p5, %p4161_p13  ;;  %p3753_p1 = por %p3752_p0, %p3751_p12 }
  0x4f   : > { %p3747_p9 = pneg %p3746_p7 }
  0x51   : > { %p3754_p2 = pnand %p3753_p1, %p3747_p9 }
  0x53   : > { %3757 = shalt.err (!%p3754_p2)
}
  0x54   : > { %3586 = dma.hbm_to_vmem [thread:$0]  (!%p4147_p11), %s4853_s5, 512, %s4151_s26, [#allocation12], %s4813_s27, %s4813_s27, %s4815_s28  }
  0x55   : > { %s4212_s20 = sadd.s32 1, %s4020_s16   ;;  %s41_s29 = sadd.s32 1, %s4016_s15 }
  0x56   : > { %4854 = sst [smem:[#allocation28_spill]] %s4212_s20  ;;  %s38_s30 = ssub.s32 %s4020_s16, %s4212_s20 }
  0x57   : > { %p48_p6 = scmp.ne.s32.totalorder %s4016_s15, %s4012_s14  ;;  %p39_p10 = scmp.eq.s32.totalorder %s38_s30, 0 }
  0x58   : > { %p49_p3 = scmp.eq.s32.totalorder %s4020_s16, 0  ;;  %p4855_p5 = scmp.eq.s32.totalorder %s4117_s17, 1 }
  0x59   : > { %p3614_p9 = scmp.lt.s32.totalorder %s4020_s16, 2  ;;  %s4812_s22 = sand.u32 1, %s4016_s15  }
  0x5a   : > { %p4222_p7 = por %p4855_p5, %p48_p6  ;;  %p50_p12 = por %p49_p3, %p48_p6 }
  0x5b   : > { %s4228_s18 = scalar_select %p39_p10, %s4016_s15, %s41_s29  }
  0x5c   : > { %s4856_s11 = scalar_select %p4222_p7, 1, 0 }
  0x5d   : > { %4858 = sst [smem:[#allocation30_spill]] %s4228_s18  ;;  %s4233_s26 = sshll.u32 %s4812_s22, 4 }
  0x5e   : > { %4857 = sst [smem:[#allocation29_spill]] %s4856_s11  ;;  %s4236_s25 = sshll.u32 %s4020_s16, 8 }
  0x5f   : > { %p4238_p0 = pnand %p3614_p9, %p50_p12  ;;  %s4821_s10 = sand.u32 1, %s4020_s16  }
  0x60   : > { %s4860_s1 = sld [smem:[#allocation31_spill]]  ;;  %s391_s22 = scalar_lea.vmem [#allocation5], %s4233_s26 }
  0x61   : > { %s4859_s23 = scalar_select %p4238_p0, 1, 0 }
  0x62   : > { %s398_s27 = sshll.u32 %s391_s22, 4  ;;  %s4254_s28 = scalar_lea.sflag [#allocation6], %s4821_s10  ;;  %s4250_s27 = int_to_ptr.vmem [resolvable:$true] %s398_s27 }
  0x63   : > { %p4260_p2 = pneg %p4238_p0 }
  0x65   : > { %s4861_s5 = scalar_select %p4260_p2, 1, 0 }
  0x66   : > { %s4247_s29 = scalar_lea.hbm %s4860_s1, %s4236_s25  ;;  %s3763_s22 = scalar_lea.hbm %s4860_s1, 512 }
  0x67   : > { %s3758_s4 = scalar_lea.hbm %s4247_s29, 256  ;;  %p3764_p3 = scmp.lt.u32.totalorder %s4247_s29, %s4860_s1 }
  0x68   : > { %p3759_p1 = scmp.ne.s32.totalorder %s4247_s29, %s3758_s4  ;;  %p3765_p5 = scmp.lt.u32.totalorder %s3763_s22, %s3758_s4 }
  0x69   : > { %p3767_p12 = scmp.lt.u32.totalorder %s3758_s4, %s4247_s29 }
  0x6a   : > { %p3761_p6 = pnand %p4260_p2, %p3759_p1  ;;  %p3766_p9 = por %p3765_p5, %p3764_p3 }
  0x6c   : > { %p3762_p10 = pneg %p3761_p6  ;;  %p3768_p7 = por %p3767_p12, %p3766_p9 }
  0x6e   : > { %p3769_p4 = pnand %p3768_p7, %p3762_p10 }
  0x70   : > { %3772 = shalt.err (!%p3769_p4)
}
  0x71   : > { %s3773_s10 = scalar_lea.vmem %s4250_s27, 256  ;;  %s4026_s13 = smov [#allocation5]  }
  0x72   : > { %p3774_p1 = scmp.ne.s32.totalorder %s4250_s27, %s3773_s10  ;;  %s3778_s30 = sshll.u32 %s4026_s13, 4  ;;  %s3779_s30 = int_to_ptr.vmem [resolvable:$false] %s3778_s30 }
  0x73   : > { %s3780_s20 = scalar_lea.vmem %s3779_s30, 512  ;;  %p3781_p11 = scmp.lt.s32.totalorder %s4250_s27, %s3779_s30 }
  0x74   : > { %p3776_p6 = pnand %p3774_p1, %p4260_p2  ;;  %p3782_p13 = scmp.lt.s32.totalorder %s3780_s20, %s3773_s10 }
  0x76   : > { %p3777_p8 = pneg %p3776_p6  ;;  %p3783_p3 = por %p3782_p13, %p3781_p11 }
  0x78   : > { %p3784_p5 = pnand %p3783_p3, %p3777_p8 }
  0x7a   : > { %3787 = shalt.err (!%p3784_p5)
}
  0x7b   : > { %s4862_s4 = smov 8   ;;  %s4863_s18 = smov 128  }
  0x7c   : > { %3599 = dma.hbm_to_vmem [thread:$0]  (!%p4238_p0), %s4247_s29, 256, %s4250_s27, %s4254_s28, %s4863_s18, %s4863_s18, %s4862_s4  }
  0x7d   : > { %s4027_s22 = smov [#allocation13]   ;;  %s4028_s13 = smov [#allocation14]  }
  0x7e   : > { %s333_s1 = sshll.u32 %s4027_s22, 4  ;;  %s346_s11 = sshll.u32 %s4028_s13, 4  ;;  %s334_s1 = int_to_ptr.vmem [resolvable:$true] %s333_s1  ;;  %s347_s11 = int_to_ptr.vmem [resolvable:$true] %s346_s11 }
  0x7f   : > { %s3788_s20 = scalar_lea.hbm %s4803_s6, 512  ;;  %p4864_p8 = scmp.ne.s32.totalorder %s4852_s12, 0 }
  0x80   : > { %p3789_p4 = scmp.ne.s32.totalorder %s4803_s6, %s3788_s20  ;;  %p3795_p7 = scmp.lt.u32.totalorder %s3788_s20, %s4803_s6 }
  0x82   : > { %p3791_p11 = pnand %p3789_p4, %p4864_p8 }
  0x84   : > { %p3792_p13 = pneg %p3791_p11 }
  0x86   : > { %p3797_p10 = pnand %p3795_p7, %p3792_p13 }
  0x88   : > { %3800 = shalt.err (!%p3797_p10)
}
  0x89   : > { %s3801_s27 = scalar_lea.vmem %s334_s1, 512  ;;  %p3809_p6 = scmp.lt.s32.totalorder %s334_s1, %s334_s1 }
  0x8a   : > { %p3802_p9 = scmp.ne.s32.totalorder %s334_s1, %s3801_s27  ;;  %p3810_p3 = scmp.lt.s32.totalorder %s3801_s27, %s3801_s27 }
  0x8c   : > { %p3804_p12 = pnand %p3802_p9, %p4864_p8  ;;  %p3811_p5 = por %p3810_p3, %p3809_p6 }
  0x8e   : > { %p3805_p1 = pneg %p3804_p12 }
  0x90   : > { %p3812_p0 = pnand %p3811_p5, %p3805_p1 }
  0x92   : > { %3815 = shalt.err (!%p3812_p0)
}
  0x93   : > { %p4865_p4 = scmp.ne.s32.totalorder %s4850_s24, 0  ;;  %s3816_s29 = scalar_lea.hbm %s4804_s7, 512 }
  0x94   : > { %p3817_p11 = scmp.ne.s32.totalorder %s4804_s7, %s3816_s29  ;;  %p3823_p7 = scmp.lt.u32.totalorder %s3816_s29, %s4804_s7 }
  0x95   : > { %3589 = dma.hbm_to_vmem [thread:$0]  (!%p4865_p4), %s4803_s6, 512, %s334_s1, [#allocation12], %s4863_s18, %s4863_s18, %s4862_s4  }
  0x96   : > { %p3819_p0 = pnand %p3817_p11, %p4864_p8 }
  0x98   : > { %p3820_p13 = pneg %p3819_p0 }
  0x9a   : > { %p3825_p10 = pnand %p3823_p7, %p3820_p13 }
  0x9c   : > { %3828 = shalt.err (!%p3825_p10)
}
  0x9d   : > { %s3829_s20 = scalar_lea.vmem %s347_s11, 512  ;;  %p3837_p6 = scmp.lt.s32.totalorder %s347_s11, %s347_s11 }
  0x9e   : > { %p3830_p9 = scmp.ne.s32.totalorder %s347_s11, %s3829_s20  ;;  %p3838_p3 = scmp.lt.s32.totalorder %s3829_s20, %s3829_s20 }
  0xa0   : > { %p3832_p12 = pnand %p3830_p9, %p4864_p8  ;;  %p3839_p5 = por %p3838_p3, %p3837_p6 }
  0xa2   : > { %p3833_p1 = pneg %p3832_p12 }
  0xa4   : > { %p3840_p2 = pnand %p3839_p5, %p3833_p1 }
  0xa6   : > { %3843 = shalt.err (!%p3840_p2)
}
  0xa7   : > { %3592 = dma.hbm_to_vmem [thread:$0]  (!%p4865_p4), %s4804_s7, 512, %s347_s11, [#allocation15], %s4863_s18, %s4863_s18, %s4862_s4  }
  0xa8   : > { %s4333_s9 = scalar_lea.hbm %s4797_s0, %s4236_s25  ;;  %s370_s24 = scalar_lea.vmem [#allocation2], %s4233_s26 }
  0xa9   : > { %s377_s17 = sshll.u32 %s370_s24, 4  ;;  %s4342_s22 = scalar_lea.hbm %s4799_s2, %s4236_s25  ;;  %s4336_s17 = int_to_ptr.vmem [resolvable:$true] %s377_s17 }
  0xaa   : > { %s4866_s13 = sand.u32 1, %s4016_s15   ;;  %s3844_s30 = scalar_lea.hbm %s4333_s9, 256 }
  0xab   : > { %s4346_s11 = scalar_lea.sflag [#allocation3], %s4866_s13  ;;  %p3845_p2 = scmp.ne.s32.totalorder %s4333_s9, %s3844_s30 }
  0xac   : > { %p4867_p8 = scmp.ne.s32.totalorder %s4861_s5, 0  ;;  %s3849_s1 = scalar_lea.hbm %s4797_s0, 512 }
  0xad   : > { %p3850_p0 = scmp.lt.u32.totalorder %s4333_s9, %s4797_s0  ;;  %p3851_p13 = scmp.lt.u32.totalorder %s3849_s1, %s3844_s30 }
  0xae   : > { %p3847_p4 = pnand %p3845_p2, %p4867_p8  ;;  %p3853_p10 = scmp.lt.u32.totalorder %s3844_s30, %s4333_s9 }
  0xaf   : > { %p3852_p7 = por %p3851_p13, %p3850_p0 }
  0xb0   : > { %p3848_p11 = pneg %p3847_p4 }
  0xb1   : > { %p3854_p9 = por %p3853_p10, %p3852_p7 }
  0xb3   : > { %p3855_p12 = pnand %p3854_p9, %p3848_p11 }
  0xb5   : > { %3858 = shalt.err (!%p3855_p12)
}
  0xb6   : > { %s3859_s8 = scalar_lea.vmem %s4336_s17, 256  ;;  %s4029_s24 = smov [#allocation2]  }
  0xb7   : > { %p3860_p1 = scmp.ne.s32.totalorder %s4336_s17, %s3859_s8  ;;  %s3864_s19 = sshll.u32 %s4029_s24, 4  ;;  %s3865_s19 = int_to_ptr.vmem [resolvable:$false] %s3864_s19 }
  0xb8   : > { %s3866_s29 = scalar_lea.vmem %s3865_s19, 512  ;;  %p3867_p5 = scmp.lt.s32.totalorder %s4336_s17, %s3865_s19 }
  0xb9   : > { %p3862_p6 = pnand %p3860_p1, %p4867_p8  ;;  %p3868_p2 = scmp.lt.s32.totalorder %s3866_s29, %s3859_s8 }
  0xbb   : > { %p3863_p3 = pneg %p3862_p6  ;;  %p3869_p4 = por %p3868_p2, %p3867_p5 }
  0xbd   : > { %p3870_p0 = pnand %p3869_p4, %p3863_p3 }
  0xbf   : > { %3873 = shalt.err (!%p3870_p0)
}
  0xc0   : > { %p4868_p11 = scmp.ne.s32.totalorder %s4859_s23, 0  ;;  %s412_s13 = scalar_lea.vmem [#allocation7], %s4233_s26 }
  0xc1   : > { %s419_s30 = sshll.u32 %s412_s13, 4  ;;  %s4380_s1 = scalar_lea.hbm %s4800_s3, %s4236_s25  ;;  %s4374_s30 = int_to_ptr.vmem [resolvable:$true] %s419_s30 }
  0xc2   : > { %3596 = dma.hbm_to_vmem [thread:$0]  (!%p4868_p11), %s4333_s9, 256, %s4336_s17, %s4346_s11, %s4863_s18, %s4863_s18, %s4862_s4  }
  0xc3   : > { %s3874_s27 = scalar_lea.hbm %s4342_s22, 256  ;;  %s3879_s24 = scalar_lea.hbm %s4799_s2, 512 }
  0xc4   : > { %p3875_p13 = scmp.ne.s32.totalorder %s4342_s22, %s3874_s27  ;;  %p3880_p9 = scmp.lt.u32.totalorder %s4342_s22, %s4799_s2 }
  0xc5   : > { %p3881_p12 = scmp.lt.u32.totalorder %s3879_s24, %s3874_s27  ;;  %p3883_p6 = scmp.lt.u32.totalorder %s3874_s27, %s4342_s22 }
  0xc6   : > { %p3877_p7 = pnand %p3875_p13, %p4867_p8 }
  0xc7   : > { %p3882_p1 = por %p3881_p12, %p3880_p9 }
  0xc8   : > { %p3878_p10 = pneg %p3877_p7 }
  0xc9   : > { %p3884_p3 = por %p3883_p6, %p3882_p1 }
  0xcb   : > { %p3885_p5 = pnand %p3884_p3, %p3878_p10 }
  0xcd   : > { %3888 = shalt.err (!%p3885_p5)
}
  0xce   : > { %s3889_s25 = scalar_lea.vmem %s4374_s30, 256  ;;  %s4030_s17 = smov [#allocation7]  }
  0xcf   : > { %p3890_p2 = scmp.ne.s32.totalorder %s4374_s30, %s3889_s25  ;;  %s3894_s11 = sshll.u32 %s4030_s17, 4  ;;  %s3895_s11 = int_to_ptr.vmem [resolvable:$false] %s3894_s11 }
  0xd0   : > { %s3896_s29 = scalar_lea.vmem %s3895_s11, 512  ;;  %p3897_p13 = scmp.lt.s32.totalorder %s4374_s30, %s3895_s11 }
  0xd1   : > { %p3892_p4 = pnand %p3890_p2, %p4867_p8  ;;  %p3898_p7 = scmp.lt.s32.totalorder %s3896_s29, %s3889_s25 }
  0xd3   : > { %p3893_p0 = pneg %p3892_p4  ;;  %p3899_p9 = por %p3898_p7, %p3897_p13 }
  0xd5   : > { %p3900_p12 = pnand %p3899_p9, %p3893_p0 }
  0xd7   : > { %3903 = shalt.err (!%p3900_p12)
}
  0xd8   : > { %3602 = dma.hbm_to_vmem [thread:$0]  (!%p4868_p11), %s4342_s22, 256, %s4374_s30, %s4254_s28, %s4863_s18, %s4863_s18, %s4862_s4  }
  0xd9   : > { %s433_s13 = scalar_lea.vmem [#allocation8], %s4233_s26  ;;  %s4869_s20 = sand.u32 1, %s4020_s16  }
  0xda   : > { %s440_s10 = sshll.u32 %s433_s13, 4  ;;  %s4412_s27 = scalar_lea.sflag [#allocation9], %s4869_s20  ;;  %s4408_s10 = int_to_ptr.vmem [resolvable:$true] %s440_s10 }
  0xdb   : > { %s3904_s12 = scalar_lea.hbm %s4380_s1, 256  ;;  %s3909_s19 = scalar_lea.hbm %s4800_s3, 512 }
  0xdc   : > { %p3905_p10 = scmp.ne.s32.totalorder %s4380_s1, %s3904_s12  ;;  %p3910_p3 = scmp.lt.u32.totalorder %s4380_s1, %s4800_s3 }
  0xdd   : > { %p3911_p5 = scmp.lt.u32.totalorder %s3909_s19, %s3904_s12  ;;  %p3913_p4 = scmp.lt.u32.totalorder %s3904_s12, %s4380_s1 }
  0xde   : > { %p3907_p1 = pnand %p3905_p10, %p4867_p8 }
  0xdf   : > { %p3912_p2 = por %p3911_p5, %p3910_p3 }
  0xe0   : > { %p3908_p6 = pneg %p3907_p1 }
  0xe1   : > { %p3914_p0 = por %p3913_p4, %p3912_p2 }
  0xe3   : > { %p3915_p13 = pnand %p3914_p0, %p3908_p6 }
  0xe5   : > { %3918 = shalt.err (!%p3915_p13)
}
  0xe6   : > { %s3919_s28 = scalar_lea.vmem %s4408_s10, 256  ;;  %s4031_s26 = smov [#allocation8]  }
  0xe7   : > { %p3920_p7 = scmp.ne.s32.totalorder %s4408_s10, %s3919_s28  ;;  %s3924_s22 = sshll.u32 %s4031_s26, 4  ;;  %s3925_s22 = int_to_ptr.vmem [resolvable:$false] %s3924_s22 }
  0xe8   : > { %s3926_s30 = scalar_lea.vmem %s3925_s22, 512  ;;  %p3927_p10 = scmp.lt.s32.totalorder %s4408_s10, %s3925_s22 }
  0xe9   : > { %p3922_p9 = pnand %p3920_p7, %p4867_p8  ;;  %p3928_p1 = scmp.lt.s32.totalorder %s3926_s30, %s3919_s28 }
  0xeb   : > { %p3923_p12 = pneg %p3922_p9  ;;  %p3929_p3 = por %p3928_p1, %p3927_p10 }
  0xed   : > { %p3930_p5 = pnand %p3929_p3, %p3923_p12 }
  0xef   : > { %3933 = shalt.err (!%p3930_p5)
}
  0xf0   : > { %3605 = dma.hbm_to_vmem [thread:$0]  (!%p4868_p11), %s4380_s1, 256, %s4408_s10, %s4412_s27, %s4863_s18, %s4863_s18, %s4862_s4  }
  0xf1   : > { %p4870_p8 = scmp.ne.s32.totalorder %s4849_s21, 0 }
  0xf2   : > { %s4871_s5 = sld [smem:[#allocation26_spill]] (!%p4870_p8)  ;;  %s4442_s17 = sand.u32 (!%p4870_p8), 1, %s4012_s14  }
  0xf3   : > { %452 = sbr.rel (%p4870_p8) target bundleno = 3601 (0xe11), region = 60  ;;  %s4445_s11 = sshll.u32 (!%p4870_p8), %s4442_s17, 4 }
  0xf4   : > { %s455_s23 = scalar_lea.sflag (!%p4870_p8), [#allocation3], %s4442_s17  ;;  %s458_s29 = scalar_lea.vmem (!%p4870_p8), [#allocation2], %s4445_s11 }
  0xf8   : > { %p4872_p6 = scmp.ne.s32.totalorder (!%p4870_p8), %s4871_s5, 0 }
  0xfa   : > { %3979 = dma.done.wait (%p4872_p6), %s455_s23, 256  }
  0xfb   : > { %3981 = vsyncadd (%p4872_p6), %s455_s23, 4294967040  ;;  %s4873_s4 = sld [smem:[#allocation25_spill]]  ;;  %s467_s1 = scalar_lea.vmem [#allocation5], %s4445_s11 }
 0x101   : > { %s463_s21 = sand.u32 1, %s4873_s4  }
 0x102   : > { %s464_s18 = scalar_lea.sflag [#allocation6], %s463_s21 }
 0x103   : > { %3983 = dma.done.wait (%p4872_p6), %s464_s18, 512  }
 0x104   : > { %3985 = vsyncadd (%p4872_p6), %s464_s18, 4294966784  ;;  %s476_s13 = scalar_lea.vmem [#allocation7], %s4445_s11  ;;  %s482_s10 = scalar_lea.sflag [#allocation9], %s463_s21 }
 0x105   : > { %s485_s20 = scalar_lea.vmem [#allocation8], %s4445_s11 }
 0x106   : > { %3987 = dma.done.wait (%p4872_p6), %s482_s10, 256  }
 0x107   : > { %3989 = vsyncadd (%p4872_p6), %s482_s10, 4294967040  ;;  %p4874_p11 = scmp.eq.s32.totalorder %s4873_s4, 0 }
 0x109   : > { %3991 = dma.done.wait (%p4874_p11), [#allocation9], 512   ;;  %p4875_p2 = pmov %p4874_p11 }
 0x10b   : > { %3993 = vsyncadd (%p4875_p2), [#allocation9], 4294966784  ;;  %p4876_p4 = pmov %p4875_p2 }
 0x10c   : > { %p4877_p0 = pmov %p4875_p2 }
 0x10d   : > { %3995 = dma.done.wait (%p4876_p4), [#allocation12], 1024  }
 0x10e   : > { %3997 = vsyncadd (%p4877_p0), [#allocation12], 4294966272  ;;  %p4878_p13 = pmov %p4877_p0 }
 0x10f   : > { %p4879_p7 = pmov %p4877_p0 }
 0x110   : > { %3999 = dma.done.wait (%p4878_p13), [#allocation15], 512  }
 0x111   : > { %4001 = vsyncadd (%p4879_p7), [#allocation15], 4294966784  ;;  %v4032_v0 = vmov 0.0|0.0   ;;  %vm4033_vm0 = vmmov 0   ;;  %v4034_v1 = vmov 0.0   ;;  %v558_v2 = vld [vmem:[#allocation10] sm:$0xff] }
 0x112   : > { %3505 = vmatprep.subr.bf16.mxu0 %v4032_v0  ;;  %3511 = vmatprep.subr.bf16.mxu1 %v4032_v0  ;;  %v559_v3 = vld [vmem:[#allocation10 + $0x8] sm:$0xff]  ;;  %v562_v4 = vld [vmem:[#allocation11] sm:$0xff]  ;;  %v560_v7 = vld [vmem:[#allocation10 + $0x10] sm:$0xff]  ;;  %vm580_vm1 = vcmask 261120   ;;  %vm801_vm2 = vcmask 64512   ;;  %s4035_s27 = smov 120  }
 0x113   : > { %3327 = vmatprep.mubr.msk.f32.mxu0 %vm4033_vm0, %v4034_v1  ;;  %3338 = vmatprep.mubr.msk.f32.mxu1 %vm4033_vm0, %v4034_v1  ;;  %v4483_v5 = vpack.c.bf16 %v559_v3, %v558_v2  ;;  %v563_v6 = vld [vmem:[#allocation11 + $0x8] sm:$0xff]  ;;  %v561_v8 = vld [vmem:[#allocation10 + $0x18] sm:$0xff]  ;;  %v564_v10 = vld [vmem:[#allocation11 + $0x10] sm:$0xff]  ;;  %s4036_s12 = smov 112   ;;  %s4037_s8 = smov 104  }
 0x114   : > { %v4485_v9 = vpack.c.bf16 %v563_v6, %v562_v4  ;;  %v565_v11 = vld [vmem:[#allocation11 + $0x18] sm:$0xff]  ;;  %v4488_v12 = vpack.c.bf16 %v561_v8, %v560_v7  ;;  %v566_v14 = vld [vmem:[#allocation13] sm:$0xff]  ;;  %v567_v15 = vld [vmem:[#allocation13 + $0x8] sm:$0xff]  ;;  %s4880_s9 = sld [smem:[#allocation34_spill]]  ;;  %s4881_s26 = sld [smem:[#allocation35_spill]] }
 0x115   : > { %3507 = vmatpush3.bf16.msra.mxu0 %v4483_v5  ;;  %v4492_v13 = vpack.c.bf16 %v565_v11, %v564_v10  ;;  %v4498_v16 = vld [vmem:[%s458_s29] sm:$0xff]  ;;  %v4500_v17 = vpack.c.bf16 %v567_v15, %v566_v14  ;;  %v569_v20 = vld [vmem:[#allocation13 + $0x18] sm:$0xff]  ;;  %v4555_v39 = vld [vmem:[#allocation14 + $0x8] sm:$0xff]  ;;  %s552_s22 = scalar_lea.vmem [#allocation16], %s4445_s11  ;;  %s4882_s30 = sld [smem:[#allocation29_spill]] }
 0x116   : > { %3513 = vmatpush3.bf16.msra.mxu1 %v4485_v9  ;;  %3508 = vmatprep.subr.bf16.mxu0 %v4032_v0  ;;  %v577_v18 = vld [vmem:[%s467_s1] sm:$0xff]  ;;  %s3240_s5 = sshll.u32 %s4873_s4, 8  ;;  %s2980_s23 = sshll.u32 %s552_s22, 4  ;;  %s4752_s23 = int_to_ptr.vmem [resolvable:$true] %s2980_s23 }
 0x117   : > { %3514 = vmatprep.subr.bf16.mxu1 %v4032_v0  ;;  %v568_v19 = vld [vmem:[#allocation13 + $0x10] sm:$0xff]  ;;  %v4541_v30 = vld [vmem:[#allocation14] sm:$0xff]  ;;  %s4883_s18 = sld [smem:[#allocation36_spill]]  ;;  %s2967_s11 = scalar_lea.sflag [#allocation4], %s4442_s17 }
 0x118   : > { %v4511_v21 = vpack.c.bf16 %v569_v20, %v568_v19  ;;  %v578_v22 = vld [vmem:[%s476_s13] sm:$0xff]  ;;  %s4038_s4 = smov [#allocation16]  }
 0x119   : > { %3510 = vmatpush3.bf16.msra.mxu0 %v4488_v12  ;;  %v4551_v31 = vld [vmem:[%s485_s20] sm:$0xff]  ;;  %s3938_s10 = sshll.u32 %s4038_s4, 4  ;;  %s3939_s10 = int_to_ptr.vmem [resolvable:$false] %s3938_s10 }
 0x11a   : > { %3516 = vmatpush3.bf16.msra.mxu1 %v4492_v13  ;;  %3517 = vmatprep.subr.bf16.mxu0 %v4032_v0  ;;  %v4576_v55 = vld [vmem:[#allocation14 + $0x10] sm:$0xff]  ;;  %p3941_p3 = scmp.lt.s32.totalorder %s4752_s23, %s3939_s10 }
 0x11b   : > { %3352 = vmatprep.subr.mxu1 %v4034_v1  ;;  %p4884_p12 = scmp.ne.s32.totalorder %s4882_s30, 0 }
 0x11c   : > { %3328 = vmatmul.mubr.msk.f32.vlgmr.msra.gmra.mrb[0].mxu0 %vm580_vm1, %v4498_v16 }
 0x11d   : > { %3339 = vmatmul.mubr.msk.f32.vlgmr.msra.gmra.mrb[0].mxu1 %vm580_vm1, %v577_v18  ;;  %3519 = vmatpush3.bf16.msra.mxu0 %v4500_v17 }
 0x11e   : > { %3520 = vmatprep.subr.bf16.mxu0 %v4032_v0  ;;  %3349 = vmatprep.mubr.msk.f32.mxu0 %vm4033_vm0, %v4034_v1 }
 0x11f   : > { %3354 = vmatprep.mubr.msk.f32.mxu1 %vm4033_vm0, %v4034_v1 }
 0x121   : > { %3522 = vmatpush3.bf16.msra.mxu0 %v4511_v21 }
 0x122   : > { %3372 = vmatprep.subr.mxu0 %v4034_v1 }
 0x124   : > { %3350 = vmatmul.mubr.msk.f32.vlgmr.msra.gmra.mrb[2].mxu0 %vm580_vm1, %v578_v22 }
 0x125   : > { %3374 = vmatprep.mubr.msk.f32.mxu0 %vm4033_vm0, %v4034_v1  ;;  %3373 = vmatpush3.msra.mxu0 %v4555_v39 }
 0x126   : > { %3377 = vmatprep.subr.mxu0 %v4034_v1 }
 0x1ef   : > { %v650_v23 = vpop.f32.mrb[0].mxu0 }
 0x1f0   : > { %v654_v24 = vmul.f32 0.35355338, %v650_v23  ;;  %v724_v25 = vpop.f32.mrb[0].mxu1  ;;  %v3329_v26 = vpop.f32.mrb[1].mxu0 }
 0x1f1   : > { %1038 = vrot.lane.b32.xlu1 %v724_v25, %s4035_s27  ;;  %v3340_v27 = vpop.f32.mrb[1].mxu1  ;;  %3353 = vmatpush3.xpose.msk.msra.mxu1 %vm801_vm2, %v724_v25 }
 0x1f2   : > { %3357 = vmatprep.subr.mxu1 %v4034_v1 }
 0x1f4   : > { %3355 = vmatmul.mubr.msk.f32.vlgmr.msra.gmra.mrb[2].mxu1 %vm801_vm2, %v654_v24 }
 0x1f5   : > { %1036 = vrot.lane.b32.xlu1 %v654_v24, %s4035_s27  ;;  %3359 = vmatprep.mubr.msk.f32.mxu1 %vm4033_vm0, %v4034_v1 }
 0x1f6   : > { %3358 = vmatpush3.msra.mxu1 %v4541_v30 }
 0x1f7   : > { %v4532_v28 = vpop.f32.mrb[2].mxu0  ;;  %3362 = vmatprep.subr.mxu1 %v4034_v1 }
 0x1f8   : > { %v3351_v29 = vpop.f32.mrb[3].mxu0  ;;  %3360 = vmatmul.mubr.msk.f32.vlgmr.msra.gmra.mrb[4].mxu1 %vm801_vm2, %v4532_v28 }
 0x1f9   : > { %1273 = vrot.lane.b32.xlu1 %v654_v24, %s4036_s12  ;;  %3364 = vmatprep.mubr.msk.f32.mxu1 %vm4033_vm0, %v4034_v1 }
 0x1fd   : > { %1125 = vrot.lane.b32.xlu1 %v4532_v28, %s4035_s27 }
 0x201   : > { %1362 = vrot.lane.b32.xlu1 %v4532_v28, %s4036_s12 }
 0x205   : > { %1512 = vrot.lane.b32.xlu1 %v724_v25, %s4037_s8 }
 0x209   : > { %1510 = vrot.lane.b32.xlu1 %v654_v24, %s4037_s8 }
 0x263   : > { %v1039_v36 = vpop.permute.xlu1 %1038 }
 0x267   : > { %v1037_v37 = vpop.permute.xlu1 %1036 }
 0x26b   : > { %v1274_v38 = vpop.permute.xlu1 %1273 }
 0x26f   : > { %v1126_v40 = vpop.permute.xlu1 %1125 }
 0x270   : > { %3375 = vmatmul.mubr.msk.f32.vlgmr.msra.gmra.mrb[4].mxu0 %vm801_vm2, %v1126_v40 }
 0x271   : > { %3379 = vmatprep.mubr.msk.f32.mxu0 %vm4033_vm0, %v4034_v1 }
 0x273   : > { %v1363_v54 = vpop.permute.xlu1 %1362 }
 0x277   : > { %v1513_v56 = vpop.permute.xlu1 %1512 }
 0x27b   : > { %v1511_v57 = vpop.permute.xlu1 %1510 }
 0x2c7   : > { %v874_v32 = vpop.f32.mrb[2].mxu1 }
 0x2c8   : > { %v875_v33 = vadd.f32 %v874_v32, %v4551_v31  ;;  %v3356_v34 = vpop.f32.mrb[3].mxu1 }
 0x2ca   : > { %v878_v35 = vsel %vm801_vm2, %v875_v33, -inf }
 0x2cb   : > { %879 = vmax.xlane.f32.xlu0 %v878_v35  ;;  %v958_v46 = vpop.f32.mrb[4].mxu1 }
 0x2cc   : > { %v3361_v47 = vpop.f32.mrb[5].mxu1  ;;  %3363 = vmatpush3.msra.mxu1 %v958_v46 }
 0x2cd   : > { %3367 = vmatprep.subr.mxu1 %v4034_v1 }
 0x343   : > { %v1195_v48 = vpop.f32.mrb[4].mxu0 }
 0x344   : > { %v3376_v49 = vpop.f32.mrb[5].mxu0  ;;  %3378 = vmatpush3.msra.mxu0 %v1195_v48 }
 0x345   : > { %3392 = vmatprep.subr.mxu0 %v4034_v1 }
 0x358   : > { %v880_v41 = vpop.xlane.xlu0 %879 }
 0x359   : > { %v881_v42 = vsub.f32 %v875_v33, %v880_v41 }
 0x35b   : > { %v882_v43 = vmul.f32 1.442695, %v881_v42  ;;  %v4624_v42 = vld [vmem:[%s458_s29 + $0x8] sm:$0xff] }
 0x35d   : > { %3666 = vpow2.f32 %v882_v43  ;;  %v3209_v43 = vld [vmem:[%s476_s13 + $0x8] sm:$0xff]  ;;  %s3934_s13 = scalar_lea.vmem %s4752_s23, 256 }
 0x35e   : > { %p3935_p9 = scmp.ne.s32.totalorder %s4752_s23, %s3934_s13 }
 0x360   : > { %p3936_p10 = pnand %p3935_p9, %p4884_p12 }
 0x362   : > { %p3937_p1 = pneg %p3936_p10 }
 0x367   : > { %v3667_v44 = vpop.eup %3666 }
 0x368   : > { %v884_v45 = vsel %vm801_vm2, %v3667_v44, 0.0 }
 0x369   : > { %885 = vadd.xlane.f32.xlu0 %v884_v45 }
 0x37f   : > { %1275 = vrot.lane.b32.xlu0 %v724_v25, %s4036_s12 }
 0x3f6   : > { %v886_v50 = vpop.xlane.xlu0 %885 }
 0x3f7   : > { %3668 = vrcp.f32 %v886_v50 }
 0x3fa   : > { %v1276_v53 = vpop.permute.xlu0 %1275 }
 0x401   : > { %v3669_v51 = vpop.eup %3668 }
 0x402   : > { %v888_v52 = vmul.f32 %v3669_v51, %v3667_v44 }
 0x404   : > { %3365 = vmatmul.mubr.msk.f32.vlgmr.msra.gmra.mrb[6].mxu1 %vm801_vm2, %v888_v52 }
 0x405   : > { %3368 = vmatpush3.xpose.msk.msra.mxu1 %vm801_vm2, %v1039_v36  ;;  %3369 = vmatprep.mubr.msk.f32.mxu1 %vm4033_vm0, %v4034_v1 }
 0x406   : > { %3382 = vmatprep.subr.mxu1 %v4034_v1 }
 0x408   : > { %3370 = vmatmul.mubr.msk.f32.vlgmr.msra.gmra.mrb[8].mxu1 %vm801_vm2, %v1037_v37  ;;  %v4611_v37 = vld [vmem:[#allocation14 + $0x18] sm:$0xff] }
 0x409   : > { %3383 = vmatpush3.xpose.msk.msra.mxu1 %vm801_vm2, %v1276_v53  ;;  %3384 = vmatprep.mubr.msk.f32.mxu1 %vm4033_vm0, %v4034_v1 }
 0x40a   : > { %3387 = vmatprep.subr.mxu1 %v4034_v1 }
 0x40c   : > { %3385 = vmatmul.mubr.msk.f32.vlgmr.msra.gmra.mrb[10].mxu1 %vm801_vm2, %v1274_v38 }
 0x40d   : > { %3388 = vmatpush3.msra.mxu1 %v4576_v55  ;;  %3389 = vmatprep.mubr.msk.f32.mxu1 %vm4033_vm0, %v4034_v1 }
 0x40e   : > { %3397 = vmatprep.subr.mxu1 %v4034_v1 }
 0x410   : > { %3390 = vmatmul.mubr.msk.f32.vlgmr.msra.gmra.mrb[12].mxu1 %vm801_vm2, %v1363_v54 }
 0x411   : > { %3399 = vmatprep.mubr.msk.f32.mxu1 %vm4033_vm0, %v4034_v1 }
 0x414   : > { %3398 = vmatpush3.xpose.msk.msra.mxu1 %vm801_vm2, %v1513_v56 }
 0x415   : > { %3523 = vmatprep.subr.bf16.mxu1 %v4032_v0 }
 0x417   : > { %3400 = vmatmul.mubr.msk.f32.vlgmr.msra.gmra.mrb[14].mxu1 %vm801_vm2, %v1511_v57 }
 0x418   : > { %3525 = vmatpush3.bf16.msra.mxu1 %v4483_v5  ;;  %3420 = vmatprep.mubr.msk.f32.mxu1 %vm4033_vm0, %v4034_v1 }
 0x419   : > { %3526 = vmatprep.subr.bf16.mxu1 %v4032_v0 }
 0x41c   : > { %3528 = vmatpush3.bf16.msra.mxu1 %v4488_v12 }
 0x41d   : > { %3535 = vmatprep.subr.bf16.mxu1 %v4032_v0 }
 0x41f   : > { %3421 = vmatmul.mubr.msk.f32.vlgmr.msra.gmra.mrb[16].mxu1 %vm580_vm1, %v4624_v42 }
 0x420   : > { %3537 = vmatpush3.bf16.msra.mxu1 %v4500_v17  ;;  %3442 = vmatprep.mubr.msk.f32.mxu1 %vm4033_vm0, %v4034_v1 }
 0x421   : > { %3538 = vmatprep.subr.bf16.mxu1 %v4032_v0 }
 0x424   : > { %3540 = vmatpush3.bf16.msra.mxu1 %v4511_v21 }
 0x425   : > { %3450 = vmatprep.subr.mxu1 %v4034_v1 }
 0x427   : > { %3443 = vmatmul.mubr.msk.f32.vlgmr.msra.gmra.mrb[18].mxu1 %vm580_vm1, %v3209_v43 }
 0x428   : > { %3451 = vmatpush3.msra.mxu1 %v4541_v30  ;;  %3452 = vmatprep.mubr.msk.f32.mxu1 %vm4033_vm0, %v4034_v1  ;;  %v3208_v30 = vld [vmem:[%s467_s1 + $0x8] sm:$0xff]  ;;  %s4750_s1 = scalar_lea.hbm %s4883_s18, %s3240_s5 }
 0x429   : > { %3460 = vmatprep.subr.mxu1 %v4034_v1 }
 0x4d7   : > { %v4595_v58 = vpop.f32.mrb[6].mxu1 }
 0x4d8   : > { %v3366_v59 = vpop.f32.mrb[7].mxu1 }
 0x4db   : > { %v1110_v60 = vpop.f32.mrb[8].mxu1 }
 0x4dc   : > { %v1111_v61 = vadd.f32 %v1110_v60, %v4551_v31  ;;  %v3371_v62 = vpop.f32.mrb[9].mxu1 }
 0x4de   : > { %v1114_v63 = vsel %vm801_vm2, %v1111_v61, -inf }
 0x4df   : > { %1115 = vmax.xlane.f32.xlu1 %v1114_v63  ;;  %v1347_v2 = vpop.f32.mrb[10].mxu1 }
 0x4e0   : > { %v1348_v3 = vadd.f32 %v1347_v2, %v4551_v31  ;;  %v3386_v4 = vpop.f32.mrb[11].mxu1 }
 0x4e2   : > { %v1351_v5 = vsel %vm801_vm2, %v1348_v3, -inf }
 0x4e3   : > { %1352 = vmax.xlane.f32.xlu0 %v1351_v5  ;;  %v1432_v6 = vpop.f32.mrb[12].mxu1 }
 0x4e4   : > { %v3391_v7 = vpop.f32.mrb[13].mxu1 }
 0x4ea   : > { %v1584_v8 = vpop.f32.mrb[14].mxu1 }
 0x4eb   : > { %v3401_v10 = vpop.f32.mrb[15].mxu1  ;;  %v1585_v24 = vadd.f32 %v1584_v8, %v4551_v31 }
 0x4ed   : > { %v1588_v26 = vsel %vm801_vm2, %v1585_v24, -inf }
 0x4f2   : > { %v1853_v47 = vpop.f32.mrb[16].mxu1 }
 0x4f3   : > { %v1857_v48 = vmul.f32 0.35355338, %v1853_v47  ;;  %v3422_v49 = vpop.f32.mrb[17].mxu1 }
 0x56c   : > { %v1116_v11 = vpop.xlane.xlu1 %1115 }
 0x56d   : > { %v1117_v12 = vsub.f32 %v1111_v61, %v1116_v11  ;;  %v4685_v61 = vld [vmem:[%s485_s20 + $0x8] sm:$0xff]  ;;  %s3940_s20 = scalar_lea.vmem %s3939_s10, 512 }
 0x56e   : > { %p3942_p5 = scmp.lt.s32.totalorder %s3940_s20, %s3934_s13 }
 0x56f   : > { %v1118_v14 = vmul.f32 1.442695, %v1117_v12 }
 0x570   : > { %v1353_v15 = vpop.xlane.xlu0 %1352  ;;  %p3943_p8 = por %p3942_p5, %p3941_p3 }
 0x571   : > { %3670 = vpow2.f32 %v1118_v14  ;;  %v1354_v18 = vsub.f32 %v1348_v3, %v1353_v15 }
 0x572   : > { %p3944_p6 = pnand %p3943_p8, %p3937_p1 }
 0x573   : > { %v1355_v19 = vmul.f32 1.442695, %v1354_v18 }
 0x575   : > { %3672 = vpow2.f32 %v1355_v19 }
 0x57b   : > { %v3671_v20 = vpop.eup %3670 }
 0x57c   : > { %v1120_v22 = vsel %vm801_vm2, %v3671_v20, 0.0 }
 0x57d   : > { %1121 = vadd.xlane.f32.xlu0 %v1120_v22 }
 0x57f   : > { %v3673_v23 = vpop.eup %3672 }
 0x580   : > { %v1357_v25 = vsel %vm801_vm2, %v3673_v23, 0.0 }
 0x581   : > { %1358 = vadd.xlane.f32.xlu1 %v1357_v25 }
 0x585   : > { %1589 = vmax.xlane.f32.xlu1 %v1588_v26 }
 0x593   : > { %1599 = vrot.lane.b32.xlu0 %v4532_v28, %s4037_s8 }
 0x597   : > { %2238 = vrot.lane.b32.xlu0 %v1857_v48, %s4035_s27 }
 0x60a   : > { %v1122_v27 = vpop.xlane.xlu0 %1121 }
 0x60b   : > { %3674 = vrcp.f32 %v1122_v27 }
 0x60e   : > { %v1359_v29 = vpop.xlane.xlu1 %1358  ;;  %v1600_v41 = vpop.permute.xlu0 %1599 }
 0x60f   : > { %3676 = vrcp.f32 %v1359_v29 }
 0x612   : > { %v1590_v32 = vpop.xlane.xlu1 %1589 }
 0x613   : > { %v1591_v33 = vsub.f32 %v1585_v24, %v1590_v32 }
 0x615   : > { %v3675_v34 = vpop.eup %3674  ;;  %v1592_v35 = vmul.f32 1.442695, %v1591_v33 }
 0x616   : > { %v1124_v36 = vmul.f32 %v3675_v34, %v3671_v20 }
 0x617   : > { %3678 = vpow2.f32 %v1592_v35 }
 0x618   : > { %3380 = vmatmul.mubr.msk.f32.vlgmr.msra.gmra.mrb[6].mxu0 %vm801_vm2, %v1124_v36 }
 0x619   : > { %3393 = vmatpush3.msra.mxu0 %v1432_v6  ;;  %3394 = vmatprep.mubr.msk.f32.mxu0 %vm4033_vm0, %v4034_v1  ;;  %v3677_v28 = vpop.eup %3676 }
 0x61a   : > { %3402 = vmatprep.subr.mxu0 %v4034_v1  ;;  %v1361_v31 = vmul.f32 %v3677_v28, %v3673_v23 }
 0x620   : > { %3395 = vmatmul.mubr.msk.f32.vlgmr.msra.gmra.mrb[6].mxu0 %vm801_vm2, %v1361_v31 }
 0x621   : > { %v3679_v38 = vpop.eup %3678  ;;  %3403 = vmatpush3.msra.mxu0 %v4611_v37  ;;  %3404 = vmatprep.mubr.msk.f32.mxu0 %vm4033_vm0, %v4034_v1 }
 0x622   : > { %v1594_v40 = vsel %vm801_vm2, %v3679_v38, 0.0  ;;  %3407 = vmatprep.subr.mxu0 %v4034_v1 }
 0x623   : > { %1595 = vadd.xlane.f32.xlu1 %v1594_v40 }
 0x624   : > { %3405 = vmatmul.mubr.msk.f32.vlgmr.msra.gmra.mrb[8].mxu0 %vm801_vm2, %v1600_v41 }
 0x625   : > { %3409 = vmatprep.mubr.msk.f32.mxu0 %vm4033_vm0, %v4034_v1 }
 0x6b0   : > { %v1596_v17 = vpop.xlane.xlu1 %1595 }
 0x6b1   : > { %3680 = vrcp.f32 %v1596_v17 }
 0x6bb   : > { %v3681_v44 = vpop.eup %3680 }
 0x6bc   : > { %v1598_v45 = vmul.f32 %v3681_v44, %v3679_v38 }
 0x6f7   : > { %v1669_v46 = vpop.f32.mrb[8].mxu0 }
 0x6f8   : > { %v3406_v21 = vpop.f32.mrb[9].mxu0  ;;  %3408 = vmatpush3.msra.mxu0 %v1669_v46 }
 0x6f9   : > { %3410 = vmatmul.mubr.msk.f32.vlgmr.msra.gmra.mrb[6].mxu0 %vm801_vm2, %v1598_v45  ;;  %3529 = vmatprep.subr.bf16.mxu0 %v4032_v0 }
 0x6fa   : > { %3531 = vmatpush3.bf16.msra.mxu0 %v4485_v9  ;;  %3431 = vmatprep.mubr.msk.f32.mxu0 %vm4033_vm0, %v4034_v1  ;;  %v2000_v9 = vpop.f32.mrb[18].mxu1 }
 0x6fb   : > { %3532 = vmatprep.subr.bf16.mxu0 %v4032_v0  ;;  %3453 = vmatmul.mubr.msk.f32.vlgmr.msra.gmra.mrb[20].mxu1 %vm801_vm2, %v2000_v9  ;;  %v3444_v0 = vpop.f32.mrb[19].mxu1 }
 0x6fc   : > { %3462 = vmatprep.mubr.msk.f32.mxu1 %vm4033_vm0, %v4034_v1 }
 0x6fe   : > { %3534 = vmatpush3.bf16.msra.mxu0 %v4492_v13  ;;  %v1035_v13 = vadd.f32 %v4595_v58, %v4498_v16  ;;  %v2239_v16 = vpop.permute.xlu0 %2238 }
 0x6ff   : > { %3445 = vmatprep.subr.mxu0 %v4034_v1 }
 0x701   : > { %3432 = vmatmul.mubr.msk.f32.vlgmr.msra.gmra.mrb[10].mxu0 %vm580_vm1, %v3208_v30 }
 0x702   : > { %3447 = vmatprep.mubr.msk.f32.mxu0 %vm4033_vm0, %v4034_v1 }
 0x7cc   : > { %v1742_v50 = vpop.f32.mrb[6].mxu0 }
 0x7cd   : > { %v4660_v51 = vadd.f32 %v1742_v50, %v1035_v13  ;;  %v3411_v52 = vpop.f32.mrb[7].mxu0 }
 0x7ce   : > { %v2160_v57 = vpop.f32.mrb[20].mxu1 }
 0x7cf   : > { %v3454_v58 = vpop.f32.mrb[21].mxu1 }
 0x7d4   : > { %v1927_v53 = vpop.f32.mrb[10].mxu0 }
 0x7d5   : > { %2240 = vrot.lane.b32.xlu1 %v1927_v53, %s4035_s27  ;;  %v3433_v54 = vpop.f32.mrb[11].mxu0  ;;  %3446 = vmatpush3.xpose.msk.msra.mxu0 %vm801_vm2, %v1927_v53 }
 0x7d6   : > { %2477 = vrot.lane.b32.xlu0 %v1927_v53, %s4036_s12  ;;  %3455 = vmatprep.subr.mxu0 %v4034_v1 }
 0x7d8   : > { %3448 = vmatmul.mubr.msk.f32.vlgmr.msra.gmra.mrb[12].mxu0 %vm801_vm2, %v1857_v48 }
 0x7d9   : > { %2475 = vrot.lane.b32.xlu1 %v1857_v48, %s4036_s12  ;;  %3457 = vmatprep.mubr.msk.f32.mxu0 %vm4033_vm0, %v4034_v1 }
 0x7da   : > { %3456 = vmatpush3.msra.mxu0 %v2160_v57 }
 0x7db   : > { %3465 = vmatprep.subr.mxu0 %v4034_v1 }
 0x847   : > { %v2241_v56 = vpop.permute.xlu1 %2240 }
 0x848   : > { %3461 = vmatpush3.xpose.msk.msra.mxu1 %vm801_vm2, %v2241_v56  ;;  %v2478_v59 = vpop.permute.xlu0 %2477 }
 0x849   : > { %3475 = vmatprep.subr.mxu1 %v4034_v1 }
 0x84b   : > { %3463 = vmatmul.mubr.msk.f32.vlgmr.msra.gmra.mrb[22].mxu1 %vm801_vm2, %v2239_v16  ;;  %v2476_v60 = vpop.permute.xlu1 %2475 }
 0x84c   : > { %3476 = vmatpush3.xpose.msk.msra.mxu1 %vm801_vm2, %v2478_v59  ;;  %3477 = vmatprep.mubr.msk.f32.mxu1 %vm4033_vm0, %v4034_v1 }
 0x84d   : > { %3480 = vmatprep.subr.mxu1 %v4034_v1 }
 0x84f   : > { %3478 = vmatmul.mubr.msk.f32.vlgmr.msra.gmra.mrb[24].mxu1 %vm801_vm2, %v2476_v60 }
 0x850   : > { %3481 = vmatpush3.msra.mxu1 %v4576_v55  ;;  %3482 = vmatprep.mubr.msk.f32.mxu1 %vm4033_vm0, %v4034_v1 }
 0x851   : > { %3490 = vmatprep.subr.mxu1 %v4034_v1 }
 0x8ab   : > { %v2076_v62 = vpop.f32.mrb[12].mxu0 }
 0x8ac   : > { %v2077_v63 = vadd.f32 %v4685_v61, %v2076_v62  ;;  %v3449_v2 = vpop.f32.mrb[13].mxu0 }
 0x8ae   : > { %v2080_v3 = vsel %vm801_vm2, %v2077_v63, -inf }
 0x8af   : > { %2081 = vmax.xlane.f32.xlu0 %v2080_v3 }
 0x8c5   : > { %2327 = vrot.lane.b32.xlu0 %v2000_v9, %s4035_s27 }
 0x8c9   : > { %2714 = vrot.lane.b32.xlu0 %v1927_v53, %s4037_s8 }
 0x91e   : > { %v2312_v55 = vpop.f32.mrb[22].mxu1 }
 0x91f   : > { %v2313_v4 = vadd.f32 %v4685_v61, %v2312_v55  ;;  %v3464_v5 = vpop.f32.mrb[23].mxu1 }
 0x921   : > { %v2316_v6 = vsel %vm801_vm2, %v2313_v4, -inf }
 0x922   : > { %v2549_v7 = vpop.f32.mrb[24].mxu1  ;;  %2317 = vmax.xlane.f32.xlu0 %v2316_v6 }
 0x923   : > { %v3479_v8 = vpop.f32.mrb[25].mxu1  ;;  %v2550_v18 = vadd.f32 %v4685_v61, %v2549_v7 }
 0x925   : > { %v2553_v19 = vsel %vm801_vm2, %v2550_v18, -inf }
 0x93c   : > { %v2082_v10 = vpop.xlane.xlu0 %2081 }
 0x93d   : > { %v2083_v11 = vsub.f32 %v2077_v63, %v2082_v10 }
 0x93f   : > { %v2084_v12 = vmul.f32 1.442695, %v2083_v11 }
 0x940   : > { %v2328_v20 = vpop.permute.xlu0 %2327 }
 0x941   : > { %3682 = vpow2.f32 %v2084_v12 }
 0x944   : > { %v2715_v22 = vpop.permute.xlu0 %2714 }
 0x94b   : > { %v3683_v14 = vpop.eup %3682 }
 0x94c   : > { %v2086_v15 = vsel %vm801_vm2, %v3683_v14, 0.0 }
 0x94d   : > { %2087 = vadd.xlane.f32.xlu1 %v2086_v15  ;;  %v3205_v15 = vld [vmem:[%s4880_s9] ss:$0 sm:$0xff] }
 0x95e   : > { %2564 = vrot.lane.b32.xlu1 %v2000_v9, %s4036_s12 }
 0x962   : > { %2712 = vrot.lane.b32.xlu1 %v1857_v48, %s4037_s8 }
 0x986   : > { %2554 = vmax.xlane.f32.xlu1 %v2553_v19  ;;  %v3206_v19 = vld [vmem:[%s4881_s26] ss:$0 sm:$0xff] }
 0x997   : > { %2801 = vrot.lane.b32.xlu1 %v2000_v9, %s4037_s8 }
 0x9af   : > { %v2318_v23 = vpop.xlane.xlu0 %2317 }
 0x9b0   : > { %v2319_v24 = vsub.f32 %v2313_v4, %v2318_v23 }
 0x9b2   : > { %v2320_v25 = vmul.f32 1.442695, %v2319_v24 }
 0x9b4   : > { %3684 = vpow2.f32 %v2320_v25 }
 0x9be   : > { %v3685_v26 = vpop.eup %3684 }
 0x9bf   : > { %v2322_v27 = vsel %vm801_vm2, %v3685_v26, 0.0 }
 0x9c0   : > { %2323 = vadd.xlane.f32.xlu0 %v2322_v27 }
 0x9da   : > { %v2088_v29 = vpop.xlane.xlu1 %2087 }
 0x9db   : > { %3686 = vrcp.f32 %v2088_v29 }
 0x9de   : > { %v2565_v32 = vpop.permute.xlu1 %2564 }
 0x9df   : > { %3483 = vmatmul.mubr.msk.f32.vlgmr.msra.gmra.mrb[26].mxu1 %vm801_vm2, %v2565_v32 }
 0x9e0   : > { %3491 = vmatpush3.xpose.msk.msra.mxu1 %vm801_vm2, %v2715_v22  ;;  %3492 = vmatprep.mubr.msk.f32.mxu1 %vm4033_vm0, %v4034_v1 }
 0x9e2   : > { %v2713_v33 = vpop.permute.xlu1 %2712 }
 0x9e3   : > { %3493 = vmatmul.mubr.msk.f32.vlgmr.msra.gmra.mrb[28].mxu1 %vm801_vm2, %v2713_v33 }
 0x9e5   : > { %v3687_v34 = vpop.eup %3686 }
 0x9e6   : > { %v2090_v35 = vmul.f32 %v3687_v34, %v3683_v14 }
 0x9e8   : > { %3458 = vmatmul.mubr.msk.f32.vlgmr.msra.gmra.mrb[14].mxu0 %vm801_vm2, %v2090_v35 }
 0x9e9   : > { %3466 = vmatpush3.msra.mxu0 %v4555_v39  ;;  %3467 = vmatprep.mubr.msk.f32.mxu0 %vm4033_vm0, %v4034_v1 }
 0x9ea   : > { %3470 = vmatprep.subr.mxu0 %v4034_v1 }
 0x9ec   : > { %3468 = vmatmul.mubr.msk.f32.vlgmr.msra.gmra.mrb[16].mxu0 %vm801_vm2, %v2328_v20 }
 0x9ed   : > { %3472 = vmatprep.mubr.msk.f32.mxu0 %vm4033_vm0, %v4034_v1 }
 0xa13   : > { %v2555_v36 = vpop.xlane.xlu1 %2554 }
 0xa14   : > { %v2556_v28 = vsub.f32 %v2550_v18, %v2555_v36 }
 0xa16   : > { %v2557_v31 = vmul.f32 1.442695, %v2556_v28 }
 0xa17   : > { %v2802_v13 = vpop.permute.xlu1 %2801 }
 0xa18   : > { %3688 = vpow2.f32 %v2557_v31 }
 0xa22   : > { %v3689_v38 = vpop.eup %3688 }
 0xa23   : > { %v2559_v40 = vsel %vm801_vm2, %v3689_v38, 0.0 }
 0xa24   : > { %2560 = vadd.xlane.f32.xlu0 %v2559_v40 }
 0xa4d   : > { %v2324_v41 = vpop.xlane.xlu0 %2323 }
 0xa4e   : > { %3690 = vrcp.f32 %v2324_v41 }
 0xa58   : > { %v3691_v30 = vpop.eup %3690 }
 0xa59   : > { %v2326_v47 = vmul.f32 %v3691_v30, %v3685_v26 }
 0xab1   : > { %v2561_v44 = vpop.xlane.xlu0 %2560 }
 0xab2   : > { %v2634_v39 = vpop.f32.mrb[26].mxu1  ;;  %3692 = vrcp.f32 %v2561_v44 }
 0xab3   : > { %v3484_v43 = vpop.f32.mrb[27].mxu1 }
 0xab6   : > { %v2786_v17 = vpop.f32.mrb[28].mxu1 }
 0xab7   : > { %v2787_v45 = vadd.f32 %v4685_v61, %v2786_v17  ;;  %v3494_v46 = vpop.f32.mrb[29].mxu1 }
 0xab9   : > { %v2790_v21 = vsel %vm801_vm2, %v2787_v45, -inf }
 0xaba   : > { %2791 = vmax.xlane.f32.xlu0 %v2790_v21 }
 0xabc   : > { %v3693_v9 = vpop.eup %3692 }
 0xabd   : > { %v2563_v0 = vmul.f32 %v3693_v9, %v3689_v38 }
 0xabf   : > { %v2397_v48 = vpop.f32.mrb[16].mxu0 }
 0xac0   : > { %v3469_v49 = vpop.f32.mrb[17].mxu0  ;;  %3471 = vmatpush3.msra.mxu0 %v2397_v48 }
 0xac1   : > { %3473 = vmatmul.mubr.msk.f32.vlgmr.msra.gmra.mrb[14].mxu0 %vm801_vm2, %v2326_v47  ;;  %3485 = vmatprep.subr.mxu0 %v4034_v1 }
 0xac2   : > { %3486 = vmatpush3.msra.mxu0 %v2634_v39  ;;  %3487 = vmatprep.mubr.msk.f32.mxu0 %vm4033_vm0, %v4034_v1 }
 0xac3   : > { %3495 = vmatprep.subr.mxu0 %v4034_v1 }
 0xac9   : > { %3488 = vmatmul.mubr.msk.f32.vlgmr.msra.gmra.mrb[14].mxu0 %vm801_vm2, %v2563_v0 }
 0xaca   : > { %3496 = vmatpush3.msra.mxu0 %v4611_v37  ;;  %3497 = vmatprep.mubr.msk.f32.mxu0 %vm4033_vm0, %v4034_v1  ;;  %v1747_v37 = vsel %vm580_vm1, %v4660_v51, 0.0 }
 0xacb   : > { %3500 = vmatprep.subr.mxu0 %v4034_v1 }
 0xacd   : > { %3498 = vmatmul.mubr.msk.f32.vlgmr.msra.gmra.mrb[18].mxu0 %vm801_vm2, %v2802_v13 }
 0xace   : > { %3502 = vmatprep.mubr.msk.f32.mxu0 %vm4033_vm0, %v4034_v1 }
 0xb47   : > { %v2792_v50 = vpop.xlane.xlu0 %2791 }
 0xb48   : > { %v2793_v52 = vsub.f32 %v2787_v45, %v2792_v50 }
 0xb4a   : > { %v2794_v53 = vmul.f32 1.442695, %v2793_v52 }
 0xb4c   : > { %3694 = vpow2.f32 %v2794_v53 }
 0xb56   : > { %v3695_v54 = vpop.eup %3694 }
 0xb57   : > { %v2796_v16 = vsel %vm801_vm2, %v3695_v54, 0.0 }
 0xb58   : > { %2797 = vadd.xlane.f32.xlu0 %v2796_v16 }
 0xb5c   : > { %1748 = vadd.xlane.f32.xlu0 %v1747_v37 }
 0xba0   : > { %v2871_v56 = vpop.f32.mrb[18].mxu0 }
 0xba1   : > { %v3499_v57 = vpop.f32.mrb[19].mxu0  ;;  %3501 = vmatpush3.msra.mxu0 %v2871_v56 }
 0xbe5   : > { %v2798_v58 = vpop.xlane.xlu0 %2797 }
 0xbe6   : > { %3696 = vrcp.f32 %v2798_v58 }
 0xbe9   : > { %v1749_v1 = vpop.xlane.xlu0 %1748 }
 0xbea   : > { %v1751_v61 = vmul.f32 0.03125, %v1749_v1 }
 0xbec   : > { %v1752_v62 = vsub.f32 %v4660_v51, %v1751_v61 }
 0xbee   : > { %v1753_v4 = vmul.f32 %v1752_v62, %v1752_v62 }
 0xbf0   : > { %v3697_v59 = vpop.eup %3696  ;;  %v1754_v5 = vsel %vm580_vm1, %v1753_v4, 0.0 }
 0xbf1   : > { %v2800_v60 = vmul.f32 %v3697_v59, %v3695_v54 }
 0xbf3   : > { %3503 = vmatmul.mubr.msk.f32.vlgmr.msra.gmra.mrb[14].mxu0 %vm801_vm2, %v2800_v60 }
 0xcc6   : > { %v2944_v63 = vpop.f32.mrb[14].mxu0 }
 0xcc7   : > { %v3543_v2 = vadd.f32 %v4624_v42, %v2944_v63  ;;  %v3504_v3 = vpop.f32.mrb[15].mxu0 }
 0xcc9   : > { %v2949_v55 = vsel %vm580_vm1, %v3543_v2, 0.0 }
 0xcca   : > { %2950 = vadd.xlane.f32.xlu0 %v2949_v55 }
 0xcce   : > { %1755 = vadd.xlane.f32.xlu0 %v1754_v5 }
 0xd57   : > { %v2951_v6 = vpop.xlane.xlu0 %2950 }
 0xd58   : > { %v2952_v7 = vmul.f32 0.03125, %v2951_v6 }
 0xd5a   : > { %v2953_v8 = vsub.f32 %v3543_v2, %v2952_v7 }
 0xd5b   : > { %v1756_v10 = vpop.xlane.xlu0 %1755 }
 0xd5c   : > { %v1757_v11 = vmul.f32 0.03125, %v1756_v10  ;;  %v2954_v12 = vmul.f32 %v2953_v8, %v2953_v8 }
 0xd5e   : > { %v1758_v14 = vadd.f32 1e-06, %v1757_v11  ;;  %v2955_v51 = vsel %vm580_vm1, %v2954_v12, 0.0 }
 0xd5f   : > { %2956 = vadd.xlane.f32.xlu1 %v2955_v51 }
 0xd60   : > { %3698 = vrsqrt.f32 %v1758_v14 }
 0xd6a   : > { %v3699_v42 = vpop.eup %3698 }
 0xd6b   : > { %v1760_v18 = vmul.f32 %v3699_v42, %v1752_v62 }
 0xd6d   : > { %v1767_v20 = vmul.f32 %v3205_v15, %v1760_v18 }
 0xd6f   : > { %v1774_v22 = vadd.f32 %v3206_v19, %v1767_v20 }
 0xd71   : > { %1775 = vst.msk [vmem:[%s552_s22] sm:$0xff] %vm580_vm1, %v1774_v22 }
 0xdec   : > { %v2957_v23 = vpop.xlane.xlu1 %2956 }
 0xded   : > { %v2958_v24 = vmul.f32 0.03125, %v2957_v23 }
 0xdef   : > { %v2959_v25 = vadd.f32 1e-06, %v2958_v24 }
 0xdf1   : > { %3700 = vrsqrt.f32 %v2959_v25 }
 0xdfb   : > { %v3701_v26 = vpop.eup %3700 }
 0xdfc   : > { %v2961_v27 = vmul.f32 %v3701_v26, %v2953_v8 }
 0xdfe   : > { %v2962_v29 = vmul.f32 %v3205_v15, %v2961_v27 }
 0xe00   : > { %v2963_v32 = vadd.f32 %v3206_v19, %v2962_v29 }
 0xe02   : > { %3230 = vst.msk [vmem:[%s552_s22 + $0x8] sm:$0xff] %vm580_vm1, %v2963_v32 }
 0xe03   : > { %3947 = shalt.err (!%p3944_p6)
}
 0xe04   : > { %s3948_s27 = scalar_lea.hbm %s4750_s1, 256  ;;  %s3952_s24 = scalar_lea.hbm %s4883_s18, 512 }
 0xe05   : > { %p3949_p11 = scmp.ne.s32.totalorder %s4750_s1, %s3948_s27  ;;  %p3953_p0 = scmp.lt.u32.totalorder %s4750_s1, %s4883_s18 }
 0xe06   : > { %p3954_p13 = scmp.lt.u32.totalorder %s3952_s24, %s3948_s27  ;;  %p3956_p9 = scmp.lt.u32.totalorder %s3948_s27, %s4750_s1 }
 0xe07   : > { %p3950_p2 = pnand %p3949_p11, %p4884_p12 }
 0xe08   : > { %p3955_p7 = por %p3954_p13, %p3953_p0 }
 0xe09   : > { %p3951_p4 = pneg %p3950_p2 }
 0xe0a   : > { %p3957_p10 = por %p3956_p9, %p3955_p7 }
 0xe0c   : > { %p3958_p1 = pnand %p3957_p10, %p3951_p4 }
 0xe0e   : > { %3961 = shalt.err (!%p3958_p1)
}
 0xe0f   : > { %s4039_s25 = smov 128   ;;  %s4040_s28 = smov 8  }
 0xe10   : > { %3578 = dma.vmem_to_hbm [thread:$0]  (%p4884_p12), %s4752_s23, 256, %s4750_s1, %s2967_s11, %s4039_s25, %s4039_s25, %s4040_s28  }
 0xe11 PF: > { %s4885_s26 = sld [smem:[#allocation24_spill]]  ;;  %s4886_s22 = sld [smem:[#allocation27_spill]] }
 0xe12   : > { %p4888_p5 = scmp.ge.s32.totalorder %s4020_s16, 2 }
 0xe17   : > { %s2995_s5 = sand.u32 1, %s4885_s26   ;;  %p4887_p3 = scmp.ne.s32.totalorder %s4886_s22, 0 }
 0xe18   : > { %s2996_s29 = scalar_lea.sflag [#allocation4], %s2995_s5 }
 0xe19   : > { %p3607_p8 = pnand %p4888_p5, %p4887_p3 }
 0xe1b   : > { %4003 = dma.done.wait (!%p3607_p8), %s2996_s29, 256  }
 0xe1c   : > { %4005 = vsyncadd (!%p3607_p8), %s2996_s29, 4294967040  ;;  %s4889_s16 = sld [smem:[#allocation28_spill]]  ;;  %s4890_s21 = sld [smem:[#allocation30_spill]] }
 0xe1d   : > { %s4891_s13 = smov %s4012_s14  ;;  %s4892_s14 = smov %s4016_s15 }
 0xe22   : > { %p31_p6 = scmp.ge.s32.totalorder %s4889_s16, 4   ;;  %s4893_s15 = smov %s4890_s21 }
 0xe24   :  { %33 = sbr.rel (!%p31_p6) target bundleno = 18 (0x12), region = 163 }
 0xe2b   :  { %3001 = vsyncpa [#allocation3], 1 }
 0xe2c   :  { %3003 = vsyncpa [#allocation3 + $0x1], 1 }
 0xe2d   :  { %3004 = vsyncpa [#allocation6], 1 }
 0xe2e   :  { %3006 = vsyncpa [#allocation6 + $0x1], 1 }
 0xe2f   :  { %3007 = vsyncpa [#allocation9], 1 }
 0xe30   :  { %3009 = vsyncpa [#allocation9 + $0x1], 1 }
 0xe31   :  { %3010 = vsyncpa [#allocation12], 1 }
 0xe32   :  { %3011 = vsyncpa [#allocation15], 1 }
 0xe33   :  { %3012 = vsyncpa [#allocation4], 1 }
 0xe34   :  { %3014 = vsyncpa [#allocation4 + $0x1], 1 }

</bundles_post_ra>
